<compile_context>
chip_gen: v7x
topology: tpu7x:2x2x1
jax: 0.10.0
libtpu: 0.0.40
codegen_flags: <defaults>
</compile_context>

<pallas_src>
import functools

import jax
import jax.numpy as jnp
from jax.experimental import pallas as pl
from jax.experimental.pallas import tpu as pltpu

_SMALL_INPUT_BYTES = 2 * 1024 * 1024   # below this, plain jnp.min/max is faster
_TARGET_BLOCK_BYTES = 4 * 1024 * 1024  # ~4 MiB input block; double-buffered it
                                       # stays well under v7x's 64 MiB VMEM
_MAX_FULL_K = 8192                     # widest column tile taken as a full row
_COL_TILE = 4096                       # lane-aligned column tile for wide rows
_L_ROW_WIDTH = 8192                    # row width for the flattened 'L' view
_VMEM_LIMIT_BYTES = 32 * 1024 * 1024   # raise v5e's 16 MiB scoped default


@functools.lru_cache(maxsize=None)
def _num_tensorcores():
    """Best-effort TensorCore-per-chip count (1 on v5e/v6e, 2 on v7x)."""
    try:
        info = pltpu.get_tpu_info()
        for name in ("num_cores", "core_count", "num_tensorcores",
                     "tensorcore_count", "num_tensor_cores"):
            v = getattr(info, name, None)
            if isinstance(v, int) and v > 0:
                return min(v, 4)
    except Exception:
        pass
    try:
        kind = jax.devices()[0].device_kind.lower()
        if "v7" in kind:           # v7x: 2 TensorCores per chip
            return 2
    except Exception:
        pass
    return 1                       # safe default: skip the megacore row cap


def _sentinels(dtype):
    """Masking identities (+big, -big) in the tensor's native dtype."""
    if jnp.issubdtype(dtype, jnp.floating):
        return float("inf"), float("-inf")
    if jnp.issubdtype(dtype, jnp.integer):
        info = jnp.iinfo(dtype)
        return int(info.max), int(info.min)
    return 1, 0


def _minmax_rows_kernel(x_ref, min_ref, max_ref, *, k_rem, mask_hi, mask_lo):
    """Per-row running min/max; the column (reduction) axis is grid axis 1."""
    j = pl.program_id(1)
    nj = pl.num_programs(1)

    @pl.when(j == 0)
    def _():
        min_ref[...] = jnp.full_like(min_ref, jnp.inf)
        max_ref[...] = jnp.full_like(max_ref, -jnp.inf)

    # Reduce in the tensor's NATIVE dtype (min/max are exact in bf16/fp16/int);
    # only the tiny (tr, 1) per-block partial is upcast to f32.  HBM traffic
    # and VPU work stay in the native width.
    # NOTE: integer magnitudes > 2^24 would lose precision in the f32
    # accumulator; the observer is only ever fed float weights / activations.
    x = x_ref[...]

    def _reduce(xmn, xmx):
        min_ref[...] = jnp.minimum(
            min_ref[...],
            jnp.min(xmn, axis=1, keepdims=True).astype(jnp.float32))
        max_ref[...] = jnp.maximum(
            max_ref[...],
            jnp.max(xmx, axis=1, keepdims=True).astype(jnp.float32))

    if k_rem == 0:
        # Column tile divides K exactly: never any masking.
        _reduce(x, x)
    else:
        # Steady-state column blocks: unmasked fast path (no iota / where).
        @pl.when(j < nj - 1)
        def _():
            _reduce(x, x)

        # Last (ragged) column block: mask the out-of-bounds columns only here.
        @pl.when(j == nj - 1)
        def _():
            col = jax.lax.broadcasted_iota(jnp.int32, x.shape, 1)
            valid = col < k_rem
            _reduce(jnp.where(valid, x, mask_hi),
                    jnp.where(valid, x, mask_lo))


def _round_up(v, m):
    return ((v + m - 1) // m) * m


def _pick_tiles(R, K, itemsize, ncores):
    """Choose (tr, tk) row/column tiles for the (R, K) row-minmax problem."""
    if K <= _MAX_FULL_K:
        tk = K                       # full row per block: no column mask needed
    else:
        tk = _COL_TILE               # multiple of 128, mask the ragged tail

    if R <= 8:
        tr = R                       # block second-to-last dim == full array dim
    else:
        budget_rows = _TARGET_BLOCK_BYTES // max(1, tk * itemsize)
        tr = max(8, (budget_rows // 8) * 8)
        tr = min(tr, (R // 8) * 8)   # keep the block inside the array, mult of 8
        if ncores >= 2:
            # Dual-TC chips only: keep >= ncores row blocks so every TensorCore
            # gets work.  On 1-TC parts this cap would only shrink blocks on a
            # mem-bound kernel, so it is skipped.
            tr = min(tr, max(8, _round_up(pl.cdiv(R, ncores), 8)))
    return tr, tk


def _row_minmax_impl(x2d):
    """Pallas per-row (min, max) of a 2D array -> two (R,) float32 arrays."""
    R, K = x2d.shape
    ncores = _num_tensorcores()
    tr, tk = _pick_tiles(R, K, x2d.dtype.itemsize, ncores)
    grid = (pl.cdiv(R, tr), pl.cdiv(K, tk))
    hi, lo = _sentinels(x2d.dtype)

    # NOTE on ragged last ROW block: the input block may read past the array;
    # the garbage rows produce garbage per-row partials, but Pallas clips the
    # partial (tr, 1) output write so those rows are discarded.  Do not move
    # output writes out of the resident-accumulator pattern without re-checking
    # this.
    mn, mx = pl.pallas_call(
        functools.partial(_minmax_rows_kernel,
                          k_rem=K % tk, mask_hi=hi, mask_lo=lo),
        out_shape=(
            jax.ShapeDtypeStruct((R, 1), jnp.float32),
            jax.ShapeDtypeStruct((R, 1), jnp.float32),
        ),
        grid_spec=pltpu.PrefetchScalarGridSpec(
            num_scalar_prefetch=0,
            grid=grid,
            in_specs=[pl.BlockSpec((tr, tk), lambda i, j: (i, j))],
            out_specs=[
                pl.BlockSpec((tr, 1), lambda i, j: (i, 0)),
                pl.BlockSpec((tr, 1), lambda i, j: (i, 0)),
            ],
        ),
        compiler_params=pltpu.CompilerParams(
            dimension_semantics=("parallel", "arbitrary"),
            vmem_limit_bytes=_VMEM_LIMIT_BYTES),
    )(x2d)
    return mn[:, 0], mx[:, 0]


def _row_minmax(x2d):
    """Per-row (min, max), with a free virtual-row split for small-R shapes."""
    R, K = x2d.shape
    ncores = _num_tensorcores()

    # Virtual-row split: present each row as `split` sub-rows so that
    #  (a) both TensorCores of a dual-TC chip get row blocks even when R is
    #      small but K is huge ('FC'-style observers), and
    #  (b) tr < 8 sublane under-utilization is avoided.
    # Only taken when the reshape is free (K divisible) and sub-rows stay
    # lane-aligned and reasonably wide.
    split = 1
    if (R < 8 or (ncores >= 2 and R < 16)) and K >= 2048:
        for s in (8, 4, 2):
            if K % (s * 128) == 0 and (K // s) >= 1024:
                split = s
                break

    if split > 1:
        mn, mx = _row_minmax_impl(x2d.reshape(R * split, K // split))
        return (jnp.min(mn.reshape(R, split), axis=1),
                jnp.max(mx.reshape(R, split), axis=1))
    return _row_minmax_impl(x2d)


class ObserverBase:
    """JAX/Pallas port of micronet ObserverBase (forward pass only)."""

    def __init__(self, q_level):
        self.q_level = q_level

    def update_range(self, min_val, max_val):
        # Abstract in the PyTorch base class; concrete observers implement it.
        raise NotImplementedError

    def forward(self, x):
        small = x.size * x.dtype.itemsize < _SMALL_INPUT_BYTES

        if self.q_level == 'L':
            if small:
                min_val, max_val = jnp.min(x), jnp.max(x)
            else:
                # Flatten, slice to a multiple of the row width (contiguous ->
                # free reshape), kernel-reduce the big head, fold the tiny
                # remainder in with a jnp reduce.  Works for any n (even prime).
                flat = x.reshape(-1)
                n = flat.size
                m = (n // _L_ROW_WIDTH) * _L_ROW_WIDTH
                if m >= _L_ROW_WIDTH:
                    mn, mx = _row_minmax(flat[:m].reshape(m // _L_ROW_WIDTH,
                                                          _L_ROW_WIDTH))
                    min_val = jnp.min(mn)
                    max_val = jnp.max(mx)
                    if m < n:
                        tail = flat[m:]
                        min_val = jnp.minimum(
                            min_val, jnp.min(tail).astype(jnp.float32))
                        max_val = jnp.maximum(
                            max_val, jnp.max(tail).astype(jnp.float32))
                    min_val = min_val.astype(x.dtype)
                    max_val = max_val.astype(x.dtype)
                else:
                    min_val, max_val = jnp.min(x), jnp.max(x)
        elif self.q_level == 'C':
            flat = x.reshape(x.shape[0], -1)       # torch.flatten(input, 1)
            if small:
                min_val = jnp.min(flat, axis=1)
                max_val = jnp.max(flat, axis=1)
            else:
                mn, mx = _row_minmax(flat)
                min_val = mn.astype(x.dtype)       # exact for float inputs
                max_val = mx.astype(x.dtype)
        elif self.q_level == 'FC':
            if small or x.ndim != 2:
                min_val = jnp.min(x, axis=1, keepdims=True)
                max_val = jnp.max(x, axis=1, keepdims=True)
            else:
                mn, mx = _row_minmax(x)
                min_val = mn[:, None].astype(x.dtype)
                max_val = mx[:, None].astype(x.dtype)
        else:
            raise ValueError(f"unknown q_level {self.q_level}")

        self.update_range(min_val, max_val)
        return min_val, max_val


class _MinMaxStoreObserver(ObserverBase):
    """Minimal concrete subclass so forward() can run (stores the range)."""

    def __init__(self, q_level):
        super().__init__(q_level)
        self.min_val = None
        self.max_val = None

    def update_range(self, min_val, max_val):
        self.min_val = min_val
        self.max_val = max_val


if __name__ == "__main__":
    key = jax.random.PRNGKey(0)
    ks = jax.random.split(key, 10)

    ok = True

    # --- small shapes (jnp bypass path) --------------------------------------
    x_act = jax.random.normal(ks[0], (2, 4, 16, 16), dtype=jnp.float32)   # 'L'
    w_conv = jax.random.normal(ks[1], (4, 4, 3, 3), dtype=jnp.float32)    # 'C'
    w_fc = jax.random.normal(ks[2], (8, 32), dtype=jnp.float32)           # 'FC'

    mn, mx = _MinMaxStoreObserver('L').forward(x_act)
    jax.block_until_ready((mn, mx))
    ok &= bool(jnp.allclose(mn, jnp.min(x_act)))
    ok &= bool(jnp.allclose(mx, jnp.max(x_act)))

    mn, mx = _MinMaxStoreObserver('C').forward(w_conv)
    jax.block_until_ready((mn, mx))
    wf = w_conv.reshape(w_conv.shape[0], -1)
    ok &= bool(jnp.allclose(mn, jnp.min(wf, axis=1)))
    ok &= bool(jnp.allclose(mx, jnp.max(wf, axis=1)))

    mn, mx = _MinMaxStoreObserver('FC').forward(w_fc)
    jax.block_until_ready((mn, mx))
    ok &= bool(jnp.allclose(mn, jnp.min(w_fc, axis=1, keepdims=True)))
    ok &= bool(jnp.allclose(mx, jnp.max(w_fc, axis=1, keepdims=True)))

    # --- larger shapes (Pallas kernel path) -----------------------------------
    # 'L' with an awkward flat size (exercises head + remainder fold-in and a
    # ragged row block inside the kernel).
    x_act_big = jax.random.normal(ks[3], (2, 64, 65, 65), dtype=jnp.float32)
    # 'C' f32 conv weight (full-row column tile, ragged row blocks).
    w_conv_big = jax.random.normal(ks[4], (512, 256, 3, 3), dtype=jnp.float32)
    # 'C' bf16 conv weight (native-dtype reduction path).
    w_conv_bf16 = jax.random.normal(ks[5], (256, 512, 3, 3),
                                    dtype=jnp.float32).astype(jnp.bfloat16)
    # 'FC' f32 weight with ragged rows AND ragged (masked) column tail.
    w_fc_ragged = jax.random.normal(ks[6], (60, 10000), dtype=jnp.float32)
    # 'FC' small-R / huge-K weight (virtual-row split path).
    w_fc_wide = jax.random.normal(ks[7], (4, 262144), dtype=jnp.float32)

    mn, mx = _MinMaxStoreObserver('L').forward(x_act_big)
    jax.block_until_ready((mn, mx))
    ok &= bool(jnp.allclose(mn, jnp.min(x_act_big)))
    ok &= bool(jnp.allclose(mx, jnp.max(x_act_big)))

    mn, mx = _MinMaxStoreObserver('C').forward(w_conv_big)
    jax.block_until_ready((mn, mx))
    wfb = w_conv_big.reshape(w_conv_big.shape[0], -1)
    ok &= bool(jnp.allclose(mn, jnp.min(wfb, axis=1)))
    ok &= bool(jnp.allclose(mx, jnp.max(wfb, axis=1)))

    mn, mx = _MinMaxStoreObserver('C').forward(w_conv_bf16)
    jax.block_until_ready((mn, mx))
    wfh = w_conv_bf16.reshape(w_conv_bf16.shape[0], -1)
    ok &= bool(jnp.all(mn == jnp.min(wfh, axis=1)))
    ok &= bool(jnp.all(mx == jnp.max(wfh, axis=1)))

    mn, mx = _MinMaxStoreObserver('FC').forward(w_fc_ragged)
    jax.block_until_ready((mn, mx))
    ok &= bool(jnp.allclose(mn, jnp.min(w_fc_ragged, axis=1, keepdims=True)))
    ok &= bool(jnp.allclose(mx, jnp.max(w_fc_ragged, axis=1, keepdims=True)))

    mn, mx = _MinMaxStoreObserver('FC').forward(w_fc_wide)
    jax.block_until_ready((mn, mx))
    ok &= bool(jnp.allclose(mn, jnp.min(w_fc_wide, axis=1, keepdims=True)))
    ok &= bool(jnp.allclose(mx, jnp.max(w_fc_wide, axis=1, keepdims=True)))

    if ok:
        print("KERNEL_OK")
    else:
        raise SystemExit("mismatch vs reference")
</pallas_src>

<mosaic_0001>
module attributes {stable_mosaic.version = 11 : i64} {
  func.func @_minmax_rows_kernel(%arg0: i32, %arg1: i32, %arg2: memref<64x8192xf32, #tpu.memory_space<vmem>>, %arg3: memref<64x1xf32, #tpu.memory_space<vmem>>, %arg4: memref<64x1xf32, #tpu.memory_space<vmem>>) attributes {dimension_semantics = [#tpu.dimension_semantics<parallel>, #tpu.dimension_semantics<arbitrary>], iteration_bounds = array<i64: 2, 1>, scalar_prefetch = 0 : i64, scratch_operands = 0 : i64, tpu.core_type = #tpu.core_type<tc>, window_params = [{transform_indices = @transform_0, window_bounds = array<i64: 64, 8192>}, {transform_indices = @transform_1, window_bounds = array<i64: 64, 1>}, {transform_indices = @transform_2, window_bounds = array<i64: 64, 1>}]} {
    %c0_i32 = arith.constant 0 : i32
    %0 = arith.cmpi eq, %arg1, %c0_i32 : i32
    %1 = arith.extui %0 : i1 to i32
    %c0_i32_0 = arith.constant 0 : i32
    %2 = arith.cmpi ne, %1, %c0_i32_0 : i32
    scf.if %2 {
      %cst_11 = arith.constant 0x7F800000 : f32
      %14 = vector.broadcast %cst_11 : f32 to vector<64x1xf32>
      %c0_12 = arith.constant 0 : index
      %c0_13 = arith.constant 0 : index
      %15 = vector.load %arg3[%c0_12, %c0_13] : memref<64x1xf32, #tpu.memory_space<vmem>>, vector<64x1xf32>
      tpu.vector_store %arg3[%c0_12, %c0_13], %14 {strides = array<i32>} : memref<64x1xf32, #tpu.memory_space<vmem>>, vector<64x1xf32>,
      %cst_14 = arith.constant 0xFF800000 : f32
      %16 = vector.broadcast %cst_14 : f32 to vector<64x1xf32>
      %c0_15 = arith.constant 0 : index
      %c0_16 = arith.constant 0 : index
      %17 = vector.load %arg4[%c0_15, %c0_16] : memref<64x1xf32, #tpu.memory_space<vmem>>, vector<64x1xf32>
      tpu.vector_store %arg4[%c0_15, %c0_16], %16 {strides = array<i32>} : memref<64x1xf32, #tpu.memory_space<vmem>>, vector<64x1xf32>,
    } else {
    }
    %c0 = arith.constant 0 : index
    %c0_1 = arith.constant 0 : index
    %3 = vector.load %arg2[%c0, %c0_1] : memref<64x8192xf32, #tpu.memory_space<vmem>>, vector<64x8192xf32>
    %c0_2 = arith.constant 0 : index
    %c0_3 = arith.constant 0 : index
    %4 = vector.load %arg3[%c0_2, %c0_3] : memref<64x1xf32, #tpu.memory_space<vmem>>, vector<64x1xf32>
    %cst = arith.constant dense<0x7F800000> : vector<64xf32>
    %5 = vector.multi_reduction <minimumf>, %3, %cst [1] : vector<64x8192xf32> to vector<64xf32>
    %6 = vector.shape_cast %5 : vector<64xf32> to vector<64x1xf32>
    %7 = arith.minimumf %4, %6 : vector<64x1xf32>
    %c0_4 = arith.constant 0 : index
    %c0_5 = arith.constant 0 : index
    %8 = vector.load %arg3[%c0_4, %c0_5] : memref<64x1xf32, #tpu.memory_space<vmem>>, vector<64x1xf32>
    tpu.vector_store %arg3[%c0_4, %c0_5], %7 {strides = array<i32>} : memref<64x1xf32, #tpu.memory_space<vmem>>, vector<64x1xf32>,
    %c0_6 = arith.constant 0 : index
    %c0_7 = arith.constant 0 : index
    %9 = vector.load %arg4[%c0_6, %c0_7] : memref<64x1xf32, #tpu.memory_space<vmem>>, vector<64x1xf32>
    %cst_8 = arith.constant dense<0xFF800000> : vector<64xf32>
    %10 = vector.multi_reduction <maximumf>, %3, %cst_8 [1] : vector<64x8192xf32> to vector<64xf32>
    %11 = vector.shape_cast %10 : vector<64xf32> to vector<64x1xf32>
    %12 = arith.maximumf %9, %11 : vector<64x1xf32>
    %c0_9 = arith.constant 0 : index
    %c0_10 = arith.constant 0 : index
    %13 = vector.load %arg4[%c0_9, %c0_10] : memref<64x1xf32, #tpu.memory_space<vmem>>, vector<64x1xf32>
    tpu.vector_store %arg4[%c0_9, %c0_10], %12 {strides = array<i32>} : memref<64x1xf32, #tpu.memory_space<vmem>>, vector<64x1xf32>,
    return
  }
  func.func @transform_0(%arg0: i32, %arg1: i32) -> (i32, i32) {
    %c0_i32 = arith.constant 0 : i32
    return %arg0, %arg1 : i32, i32
  }
  func.func @transform_1(%arg0: i32, %arg1: i32) -> (i32, i32) {
    %c0_i32 = arith.constant 0 : i32
    %c0_i32_0 = arith.constant 0 : i32
    return %arg0, %c0_i32 : i32, i32
  }
  func.func @transform_2(%arg0: i32, %arg1: i32) -> (i32, i32) {
    %c0_i32 = arith.constant 0 : i32
    %c0_i32_0 = arith.constant 0 : i32
    return %arg0, %c0_i32 : i32, i32
  }
}

</mosaic_0001>

<bundles_post_ra>
// kernel: tpu_custom_call.1
= control target key start
LH: loop header
LB: loop body
LE: loop exit
PB: predicated region body
PF: predicated region fallthrough
CT: control target
= control target key end

     0   :  { %8 = vsyncpa [#allocation3], 0  ;;  %s3963_s0 = inlined_call_operand.hbm [shape: f32[66,8192], index: 0, kind: input, shape index: {}]   ;;  %s3964_s1 = inlined_call_operand.vmem [shape: f32[66,1], index: 1, kind: output, shape index: {0}]   ;;  %s3965_s2 = inlined_call_operand.vmem [shape: f32[66,1], index: 2, kind: output, shape index: {1}]  }
   0x1   :  { %10 = vsyncpa [#allocation3 + $0x1], 0  ;;  %s2796_s9 = smov 0   ;;  %s2798_s10 = smov 0  }
   0x2   :  { %s2800_s11 = smov 0   ;;  %s2802_s12 = smov 0  }
   0x3   :  { %s2804_s13 = smov 0   ;;  %s2806_s14 = smov 0  }
   0x4 LB: > { %s2313_s15 = sadd.s32 4294967295, %s2710_s14   ;;  %s28_s16 = sadd.s32 1, %s2706_s13  ;;  %s2710_s14 = sphi %s2806_s14, %s16_s14   ;;  %s2706_s13 = sphi %s2804_s13, %s3978_s13   ;;  %s2702_s12 = sphi %s2802_s12, %s3977_s12   ;;  %s2698_s11 = sphi %s2800_s11, %s3976_s11   ;;  %s2694_s10 = sphi %s2798_s10, %s3975_s10   ;;  %s2690_s9 = sphi %s2796_s9, %s3974_s9  }
   0x5   : > { %p30_p0 = scmp.ge.s32.totalorder %s28_s16, 2  ;;  %s37_s17 = sadd.s32 1, %s2698_s11 }
   0x6   : > { %p44_p1 = scmp.ne.s32.totalorder %s2698_s11, %s2694_s10  ;;  %p45_p2 = scmp.eq.s32.totalorder %s2710_s14, 0 }
   0x7   : > { %s3980_s16 = smov (%p30_p0, %s28_s16), 0  ;;  %p50_p4 = scmp.ne.s32.totalorder %s2694_s10, %s2690_s9 }
   0x8   : > { %p46_p3 = por %p45_p2, %p44_p1  ;;  %s32_s18 = ssub.s32 %s2706_s13, %s3980_s16 }
   0x9   : > { %p51_p5 = scmp.eq.s32.totalorder %s2313_s15, 0  ;;  %p35_p6 = scmp.eq.s32.totalorder %s32_s18, 0 }
   0xa   : > { %p74_p7 = scmp.eq.s32.totalorder %s2313_s15, 1  ;;  %p2316_p10 = scmp.ge.s32.totalorder %s2710_s14, 2 }
   0xb   : > { %p2835_p8 = por %p51_p5, %p50_p4 }
   0xc   : > { %s2840_s20 = scalar_select %p35_p6, %s2698_s11, %s37_s17  }
   0xd   : > { %p2842_p9 = por %p74_p7, %p44_p1  ;;  %122 = sbr.rel (%p2316_p10) target bundleno = 55 (0x37), region = 16 }
  0x14   : > { %125 = sbr.rel (!%p46_p3) target bundleno = 55 (0x37), region = 20  ;;  %s126_s22 = sand.u32 (%p46_p3), 1, %s2698_s11  }
  0x15   : > { %s2318_s23 = sshll.u32 (%p46_p3), %s2706_s13, 3  ;;  %s2317_s24 = sshll.u32 (%p46_p3), %s126_s22, 12 }
  0x16   : > { %s133_s25 = ssub.s32 (%p46_p3), 9, %s2318_s23  ;;  %s2852_s28 = scalar_lea.sflag (%p46_p3), [#allocation3], %s126_s22 }
  0x17   : > { %p134_p11 = scmp.lt.s32.totalorder (%p46_p3), %s133_s25, 8  ;;  %s130_s29 = scalar_lea.vmem (%p46_p3), [#allocation2], %s2317_s24 }
  0x1b   : > { %s3982_s25 = smov (!%p134_p11, %s133_s25), 8 }
  0x1c   : > { %s2849_s26 = sshll.u32 %s3982_s25, 13 }
  0x1d   : > { %s139_s27 = ssub.s32 65536, %s2849_s26 }
  0x1e   : > { %140 = vsyncadd %s2852_s28, %s139_s27  ;;  %p2321_p12 = scmp.ne.s32.totalorder %s2849_s26, 0  ;;  %s2364_s30 = sshll.u32 %s2706_s13, 16 }
  0x1f   : > { %s2860_s5 = scalar_lea.hbm %s3963_s0, %s2364_s30  ;;  %s147_s6 = sshll.u32 %s130_s29, 4  ;;  %s2862_s6 = int_to_ptr.vmem [resolvable:$true] %s147_s6 }
  0x20   : > { %s2568_s7 = scalar_lea.hbm %s2860_s5, %s2849_s26  ;;  %s2572_s15 = scalar_lea.hbm %s3963_s0, 73728 }
  0x21   : > { %p2569_p13 = scmp.ne.s32.totalorder %s2860_s5, %s2568_s7  ;;  %p2573_p2 = scmp.lt.u32.totalorder %s2860_s5, %s3963_s0 }
  0x22   : > { %p2574_p3 = scmp.lt.u32.totalorder %s2572_s15, %s2568_s7  ;;  %p2576_p5 = scmp.lt.u32.totalorder %s2568_s7, %s2860_s5 }
  0x23   : > { %p2570_p0 = pnand %p2569_p13, %p2321_p12 }
  0x24   : > { %p2575_p4 = por %p2574_p3, %p2573_p2 }
  0x25   : > { %p2571_p1 = pneg %p2570_p0 }
  0x26   : > { %p2577_p6 = por %p2576_p5, %p2575_p4 }
  0x28   : > { %p2578_p7 = pnand %p2577_p6, %p2571_p1 }
  0x2a   : > { %2581 = shalt.err (!%p2578_p7)
}
  0x2b   : > { %s2582_s22 = scalar_lea.vmem %s2862_s6, %s2849_s26  ;;  %s2776_s23 = smov [#allocation2]  }
  0x2c   : > { %p2583_p10 = scmp.ne.s32.totalorder %s2862_s6, %s2582_s22  ;;  %s2586_s24 = sshll.u32 %s2776_s23, 4  ;;  %s2587_s24 = int_to_ptr.vmem [resolvable:$false] %s2586_s24 }
  0x2d   : > { %s2588_s25 = scalar_lea.vmem %s2587_s24, 131072  ;;  %p2589_p0 = scmp.lt.s32.totalorder %s2862_s6, %s2587_s24 }
  0x2e   : > { %p2584_p11 = pnand %p2583_p10, %p2321_p12  ;;  %p2590_p2 = scmp.lt.s32.totalorder %s2588_s25, %s2582_s22 }
  0x30   : > { %p2585_p13 = pneg %p2584_p11  ;;  %p2591_p3 = por %p2590_p2, %p2589_p0 }
  0x32   : > { %p2592_p4 = pnand %p2591_p3, %p2585_p13 }
  0x34   : > { %2595 = shalt.err (!%p2592_p4)
}
  0x35   : > { %s2777_s27 = smov 8192   ;;  %s2778_s29 = smov 512  }
  0x36   : > { %153 = dma.hbm_to_vmem [thread:$0]  (%p2321_p12), %s2860_s5, %s2849_s26, %s2862_s6, %s2852_s28, %s2777_s27, %s2777_s27, %s2778_s29  }
  0x37 PF: > { %p2326_p1 = scmp.ge.s32.totalorder %s2710_s14, 1  ;;  %p155_p5 = scmp.lt.s32.totalorder %s2710_s14, 3 }
  0x39   : > { %p156_p6 = pnand %p2326_p1, %p155_p5 }
  0x3a   : > { %s2892_s30 = sand.u32 (!%p156_p6), 1, %s2694_s10  }
  0x3b   : > { %159 = sbr.rel (%p156_p6) target bundleno = 645 (0x285), region = 24  ;;  %s2327_s3 = sshll.u32 (!%p156_p6), %s2892_s30, 12 }
  0x3c   : > { %s162_s4 = scalar_lea.sflag (!%p156_p6), [#allocation3], %s2892_s30  ;;  %s2896_s7 = scalar_lea.vmem (!%p156_p6), [#allocation2], %s2327_s3 }
  0x42   : > { %2685 = dma.done.wait (%p2835_p8), %s162_s4, 65536  }
  0x43   : > { %2687 = vsyncadd (%p2835_p8), %s162_s4, 4294901760  ;;  %v355_v0 = vld [vmem:[%s2896_s7 + $0x400] sm:$0xff]  ;;  %v356_v1 = vld [vmem:[%s2896_s7 + $0x408] sm:$0xff]  ;;  %s2328_s19 = sshll.u32 %s2892_s30, 6  ;;  %vm210_vm0 = vcmask 7168   ;;  %s2332_s5 = sshll.u32 (%p2842_p9), %s2702_s12, 3 }
  0x44   : > { %v357_v2 = vld [vmem:[%s2896_s7 + $0x410] sm:$0xff]  ;;  %v358_v3 = vld [vmem:[%s2896_s7 + $0x418] sm:$0xff]  ;;  %v877_v4 = vmin.f32 %v355_v0, %v356_v1  ;;  %v359_v6 = vld [vmem:[%s2896_s7 + $0x420] sm:$0xff]  ;;  %s3658_s26 = scalar_lea.vmem [#allocation4], %s2328_s19   ;;  %s3786_s28 = scalar_lea.vmem [#allocation5], %s2328_s19  }
  0x45   : > { %v1423_v5 = vmax.f32 %v358_v3, %v357_v2  ;;  %v360_v9 = vld [vmem:[%s2896_s7 + $0x428] sm:$0xff]  ;;  %v361_v12 = vld [vmem:[%s2896_s7 + $0x430] sm:$0xff]  ;;  %v362_v15 = vld [vmem:[%s2896_s7 + $0x438] sm:$0xff]  ;;  %s2365_s6 = sshll.u32 (%p2842_p9), %s2702_s12, 6  ;;  %s1840_s8 = ssub.s32 (%p2842_p9), 9, %s2332_s5 }
  0x46   : > { %v878_v7 = vmin.f32 %v877_v4, %v357_v2  ;;  %v363_v18 = vld [vmem:[%s2896_s7 + $0x440] sm:$0xff]  ;;  %v364_v21 = vld [vmem:[%s2896_s7 + $0x448] sm:$0xff]  ;;  %v365_v24 = vld [vmem:[%s2896_s7 + $0x450] sm:$0xff]  ;;  %s3850_s17 = scalar_lea.vmem (%p2842_p9), %s3964_s1, %s2365_s6   ;;  %p1841_p8 = scmp.lt.s32.totalorder (%p2842_p9), %s1840_s8, 8 }
  0x47   : > { %v1424_v8 = vmax.f32 %v1423_v5, %v359_v6  ;;  %v366_v27 = vld [vmem:[%s2896_s7 + $0x458] sm:$0xff]  ;;  %v367_v30 = vld [vmem:[%s2896_s7 + $0x460] sm:$0xff]  ;;  %v368_v33 = vld [vmem:[%s2896_s7 + $0x468] sm:$0xff] }
  0x48   : > { %v879_v10 = vmin.f32 %v878_v7, %v358_v3  ;;  %v227_v35 = vld [vmem:[%s2896_s7] sm:$0xff]  ;;  %v228_v36 = vld [vmem:[%s2896_s7 + $0x8] sm:$0xff]  ;;  %v229_v38 = vld [vmem:[%s2896_s7 + $0x10] sm:$0xff] }
  0x49   : > { %v1425_v11 = vmax.f32 %v1424_v8, %v360_v9  ;;  %v230_v39 = vld [vmem:[%s2896_s7 + $0x18] sm:$0xff]  ;;  %v747_v40 = vmin.f32 %v227_v35, %v228_v36  ;;  %v369_v41 = vld [vmem:[%s2896_s7 + $0x470] sm:$0xff]  ;;  %v231_v45 = vld [vmem:[%s2896_s7 + $0x20] sm:$0xff] }
  0x4a   : > { %v880_v13 = vmin.f32 %v879_v10, %v359_v6  ;;  %v1293_v43 = vmax.f32 %v230_v39, %v229_v38  ;;  %v370_v47 = vld [vmem:[%s2896_s7 + $0x478] sm:$0xff]  ;;  %v232_v51 = vld [vmem:[%s2896_s7 + $0x28] sm:$0xff]  ;;  %v371_v53 = vld [vmem:[%s2896_s7 + $0x480] sm:$0xff] }
  0x4b   : > { %v1426_v14 = vmax.f32 %v1425_v11, %v361_v12  ;;  %v748_v46 = vmin.f32 %v747_v40, %v229_v38  ;;  %v233_v57 = vld [vmem:[%s2896_s7 + $0x30] sm:$0xff]  ;;  %v372_v59 = vld [vmem:[%s2896_s7 + $0x488] sm:$0xff]  ;;  %v234_v63 = vld [vmem:[%s2896_s7 + $0x38] sm:$0xff] }
  0x4c   : > { %v881_v16 = vmin.f32 %v880_v13, %v360_v9  ;;  %v1294_v49 = vmax.f32 %v1293_v43, %v231_v45  ;;  %v373_v1 = vld [vmem:[%s2896_s7 + $0x490] sm:$0xff]  ;;  %v235_v5 = vld [vmem:[%s2896_s7 + $0x40] sm:$0xff]  ;;  %v374_v7 = vld [vmem:[%s2896_s7 + $0x498] sm:$0xff] }
  0x4d   : > { %v1427_v17 = vmax.f32 %v1426_v14, %v362_v15  ;;  %v749_v52 = vmin.f32 %v748_v46, %v230_v39  ;;  %v236_v11 = vld [vmem:[%s2896_s7 + $0x48] sm:$0xff]  ;;  %v375_v13 = vld [vmem:[%s2896_s7 + $0x4a0] sm:$0xff]  ;;  %v422_v43 = vld [vmem:[%s2896_s7 + $0x618] sm:$0xff] }
  0x4e   : > { %v882_v19 = vmin.f32 %v881_v16, %v361_v12  ;;  %v1295_v55 = vmax.f32 %v1294_v49, %v232_v51  ;;  %v379_v35 = vld [vmem:[%s2896_s7 + $0x4c0] sm:$0xff]  ;;  %v240_v36 = vld [vmem:[%s2896_s7 + $0x68] sm:$0xff] }
  0x4f   : > { %v1428_v20 = vmax.f32 %v1427_v17, %v363_v18  ;;  %v750_v58 = vmin.f32 %v749_v52, %v231_v45  ;;  %v237_v17 = vld [vmem:[%s2896_s7 + $0x50] sm:$0xff]  ;;  %v419_v38 = vld [vmem:[%s2896_s7 + $0x600] sm:$0xff]  ;;  %v380_v49 = vld [vmem:[%s2896_s7 + $0x4c8] sm:$0xff] }
  0x50   : > { %v883_v22 = vmin.f32 %v882_v19, %v362_v15  ;;  %v1296_v61 = vmax.f32 %v1295_v55, %v233_v57  ;;  %v376_v19 = vld [vmem:[%s2896_s7 + $0x4a8] sm:$0xff]  ;;  %v241_v45 = vld [vmem:[%s2896_s7 + $0x70] sm:$0xff]  ;;  %v423_v52 = vld [vmem:[%s2896_s7 + $0x620] sm:$0xff] }
  0x51   : > { %v1429_v23 = vmax.f32 %v1428_v20, %v364_v21  ;;  %v751_v0 = vmin.f32 %v750_v58, %v232_v51  ;;  %v381_v58 = vld [vmem:[%s2896_s7 + $0x4d0] sm:$0xff] }
  0x52   : > { %v884_v25 = vmin.f32 %v883_v22, %v363_v18  ;;  %v1297_v3 = vmax.f32 %v1296_v61, %v234_v63  ;;  %v424_v61 = vld [vmem:[%s2896_s7 + $0x628] sm:$0xff] }
  0x53   : > { %v1430_v26 = vmax.f32 %v1429_v23, %v365_v24  ;;  %v752_v6 = vmin.f32 %v751_v0, %v233_v57  ;;  %v238_v23 = vld [vmem:[%s2896_s7 + $0x58] sm:$0xff] }
  0x54   : > { %v885_v28 = vmin.f32 %v884_v25, %v364_v21  ;;  %v1298_v9 = vmax.f32 %v1297_v3, %v235_v5  ;;  %v377_v25 = vld [vmem:[%s2896_s7 + $0x4b0] sm:$0xff]  ;;  %v382_v3 = vld [vmem:[%s2896_s7 + $0x4d8] sm:$0xff] }
  0x55   : > { %v1431_v29 = vmax.f32 %v1430_v26, %v366_v27  ;;  %v753_v12 = vmin.f32 %v752_v6, %v234_v63  ;;  %v243_v63 = vld [vmem:[%s2896_s7 + $0x80] sm:$0xff]  ;;  %v425_v6 = vld [vmem:[%s2896_s7 + $0x630] sm:$0xff] }
  0x56   : > { %v886_v31 = vmin.f32 %v885_v28, %v365_v24  ;;  %v1299_v15 = vmax.f32 %v1298_v9, %v236_v11 }
  0x57   : > { %v1432_v32 = vmax.f32 %v1431_v29, %v367_v30  ;;  %v754_v18 = vmin.f32 %v753_v12, %v235_v5  ;;  %v239_v29 = vld [vmem:[%s2896_s7 + $0x60] sm:$0xff] }
  0x58   : > { %v887_v34 = vmin.f32 %v886_v31, %v366_v27  ;;  %v1300_v21 = vmax.f32 %v1299_v15, %v237_v17  ;;  %v378_v31 = vld [vmem:[%s2896_s7 + $0x4b8] sm:$0xff]  ;;  %v383_v12 = vld [vmem:[%s2896_s7 + $0x4e0] sm:$0xff] }
  0x59   : > { %v1433_v37 = vmax.f32 %v1432_v32, %v368_v33  ;;  %v755_v24 = vmin.f32 %v754_v18, %v236_v11  ;;  %v426_v15 = vld [vmem:[%s2896_s7 + $0x638] sm:$0xff] }
  0x5a   : > { %v888_v42 = vmin.f32 %v887_v34, %v367_v30  ;;  %v1301_v27 = vmax.f32 %v1300_v21, %v238_v23  ;;  %v384_v21 = vld [vmem:[%s2896_s7 + $0x4e8] sm:$0xff] }
  0x5b   : > { %v1434_v44 = vmax.f32 %v1433_v37, %v369_v41  ;;  %v756_v30 = vmin.f32 %v755_v24, %v237_v17  ;;  %v245_v17 = vld [vmem:[%s2896_s7 + $0x90] sm:$0xff]  ;;  %v427_v24 = vld [vmem:[%s2896_s7 + $0x640] sm:$0xff] }
  0x5c   : > { %v889_v48 = vmin.f32 %v888_v42, %v368_v33  ;;  %v1302_v33 = vmax.f32 %v1301_v27, %v239_v29  ;;  %v421_v42 = vld [vmem:[%s2896_s7 + $0x610] sm:$0xff] }
  0x5d   : > { %v1435_v50 = vmax.f32 %v1434_v44, %v370_v47  ;;  %v757_v37 = vmin.f32 %v756_v30, %v238_v23  ;;  %v385_v30 = vld [vmem:[%s2896_s7 + $0x4f0] sm:$0xff] }
  0x5e   : > { %v890_v54 = vmin.f32 %v889_v48, %v369_v41  ;;  %v1303_v40 = vmax.f32 %v1302_v33, %v240_v36  ;;  %v420_v41 = vld [vmem:[%s2896_s7 + $0x608] sm:$0xff] }
  0x5f   : > { %v1436_v56 = vmax.f32 %v1435_v50, %v371_v53  ;;  %v758_v46 = vmin.f32 %v757_v37, %v239_v29  ;;  %v942_v48 = vmin.f32 %v419_v38, %v420_v41  ;;  %v428_v33 = vld [vmem:[%s2896_s7 + $0x648] sm:$0xff] }
  0x60   : > { %v891_v60 = vmin.f32 %v890_v54, %v370_v47  ;;  %v1488_v47 = vmax.f32 %v422_v43, %v421_v42  ;;  %v1304_v51 = vmax.f32 %v1303_v40, %v241_v45  ;;  %v242_v54 = vld [vmem:[%s2896_s7 + $0x78] sm:$0xff] }
  0x61   : > { %v1437_v62 = vmax.f32 %v1436_v56, %v372_v59  ;;  %v759_v55 = vmin.f32 %v758_v46, %v240_v36  ;;  %v943_v57 = vmin.f32 %v942_v48, %v421_v42  ;;  %v429_v42 = vld [vmem:[%s2896_s7 + $0x650] sm:$0xff]  ;;  %v387_v48 = vld [vmem:[%s2896_s7 + $0x500] sm:$0xff] }
  0x62   : > { %v892_v2 = vmin.f32 %v891_v60, %v371_v53  ;;  %v1489_v56 = vmax.f32 %v1488_v47, %v423_v52  ;;  %v1305_v60 = vmax.f32 %v1304_v51, %v242_v54  ;;  %v430_v51 = vld [vmem:[%s2896_s7 + $0x658] sm:$0xff] }
  0x63   : > { %v1438_v4 = vmax.f32 %v1437_v62, %v373_v1  ;;  %v760_v0 = vmin.f32 %v759_v55, %v241_v45 }
  0x64   : > { %v893_v8 = vmin.f32 %v892_v2, %v372_v59  ;;  %v944_v2 = vmin.f32 %v943_v57, %v422_v43  ;;  %v1306_v5 = vmax.f32 %v1305_v60, %v243_v63  ;;  %v388_v57 = vld [vmem:[%s2896_s7 + $0x508] sm:$0xff]  ;;  %v431_v60 = vld [vmem:[%s2896_s7 + $0x660] sm:$0xff] }
  0x65   : > { %v1439_v10 = vmax.f32 %v1438_v4, %v374_v7  ;;  %v761_v9 = vmin.f32 %v760_v0, %v242_v54 }
  0x66   : > { %v894_v14 = vmin.f32 %v893_v8, %v373_v1  ;;  %v1490_v1 = vmax.f32 %v1489_v56, %v424_v61  ;;  %v244_v8 = vld [vmem:[%s2896_s7 + $0x88] sm:$0xff]  ;;  %v945_v11 = vmin.f32 %v944_v2, %v423_v52  ;;  %v389_v2 = vld [vmem:[%s2896_s7 + $0x510] sm:$0xff] }
  0x67   : > { %v1440_v16 = vmax.f32 %v1439_v10, %v375_v13  ;;  %v762_v18 = vmin.f32 %v761_v9, %v243_v63 }
  0x68   : > { %v895_v20 = vmin.f32 %v894_v14, %v374_v7  ;;  %v1491_v10 = vmax.f32 %v1490_v1, %v425_v6  ;;  %v1307_v14 = vmax.f32 %v1306_v5, %v244_v8  ;;  %v251_v5 = vld [vmem:[%s2896_s7 + $0xc0] sm:$0xff] }
  0x69   : > { %v1441_v22 = vmax.f32 %v1440_v16, %v376_v19  ;;  %v763_v27 = vmin.f32 %v762_v18, %v244_v8 }
  0x6a   : > { %v896_v26 = vmin.f32 %v895_v20, %v375_v13  ;;  %v946_v20 = vmin.f32 %v945_v11, %v424_v61  ;;  %v1308_v23 = vmax.f32 %v1307_v14, %v245_v17  ;;  %v291_v11 = vld [vmem:[%s2896_s7 + $0x200] sm:$0xff]  ;;  %v390_v14 = vld [vmem:[%s2896_s7 + $0x518] sm:$0xff] }
  0x6b   : > { %v1442_v28 = vmax.f32 %v1441_v22, %v377_v25  ;;  %v764_v36 = vmin.f32 %v763_v27, %v245_v17  ;;  %v433_v17 = vld [vmem:[%s2896_s7 + $0x670] sm:$0xff] }
  0x6c   : > { %v897_v32 = vmin.f32 %v896_v26, %v376_v19  ;;  %v1492_v19 = vmax.f32 %v1491_v10, %v426_v15  ;;  %v246_v26 = vld [vmem:[%s2896_s7 + $0x98] sm:$0xff]  ;;  %v947_v29 = vmin.f32 %v946_v20, %v425_v6  ;;  %v432_v6 = vld [vmem:[%s2896_s7 + $0x668] sm:$0xff] }
  0x6d   : > { %v1443_v34 = vmax.f32 %v1442_v28, %v378_v31  ;;  %v765_v45 = vmin.f32 %v764_v36, %v246_v26  ;;  %v252_v20 = vld [vmem:[%s2896_s7 + $0xc8] sm:$0xff]  ;;  %v295_v36 = vld [vmem:[%s2896_s7 + $0x220] sm:$0xff] }
  0x6e   : > { %v898_v39 = vmin.f32 %v897_v32, %v377_v25  ;;  %v1493_v28 = vmax.f32 %v1492_v19, %v427_v24  ;;  %v1309_v32 = vmax.f32 %v1308_v23, %v246_v26  ;;  %v948_v38 = vmin.f32 %v947_v29, %v426_v15 }
  0x6f   : > { %v1444_v44 = vmax.f32 %v1443_v34, %v379_v35 }
  0x70   : > { %v899_v50 = vmin.f32 %v898_v39, %v378_v31  ;;  %v1494_v37 = vmax.f32 %v1493_v28, %v428_v33  ;;  %v386_v39 = vld [vmem:[%s2896_s7 + $0x4f8] sm:$0xff]  ;;  %v949_v47 = vmin.f32 %v948_v38, %v427_v24 }
  0x71   : > { %v1445_v53 = vmax.f32 %v1444_v44, %v380_v49  ;;  %v248_v44 = vld [vmem:[%s2896_s7 + $0xa8] sm:$0xff]  ;;  %v294_v24 = vld [vmem:[%s2896_s7 + $0x218] sm:$0xff] }
  0x72   : > { %v900_v59 = vmin.f32 %v899_v50, %v379_v35  ;;  %v247_v35 = vld [vmem:[%s2896_s7 + $0xa0] sm:$0xff]  ;;  %v1495_v46 = vmax.f32 %v1494_v37, %v429_v42  ;;  %v950_v56 = vmin.f32 %v949_v47, %v428_v33  ;;  %v434_v28 = vld [vmem:[%s2896_s7 + $0x678] sm:$0xff]  ;;  %v392_v37 = vld [vmem:[%s2896_s7 + $0x528] sm:$0xff] }
  0x73   : > { %v1446_v62 = vmax.f32 %v1445_v53, %v381_v58  ;;  %v1310_v41 = vmax.f32 %v1309_v32, %v247_v35  ;;  %v249_v53 = vld [vmem:[%s2896_s7 + $0xb0] sm:$0xff]  ;;  %v766_v54 = vmin.f32 %v765_v45, %v247_v35 }
  0x74   : > { %v901_v4 = vmin.f32 %v900_v59, %v380_v49  ;;  %v1496_v55 = vmax.f32 %v1495_v46, %v430_v51  ;;  %v951_v1 = vmin.f32 %v950_v56, %v429_v42  ;;  %v253_v32 = vld [vmem:[%s2896_s7 + $0xd0] sm:$0xff]  ;;  %v255_v56 = vld [vmem:[%s2896_s7 + $0xe0] sm:$0xff] }
  0x75   : > { %v1447_v7 = vmax.f32 %v1446_v62, %v382_v3  ;;  %v1311_v50 = vmax.f32 %v1310_v41, %v248_v44  ;;  %v250_v62 = vld [vmem:[%s2896_s7 + $0xb8] sm:$0xff]  ;;  %v767_v63 = vmin.f32 %v766_v54, %v248_v44 }
  0x76   : > { %v902_v13 = vmin.f32 %v901_v4, %v381_v58  ;;  %v1497_v0 = vmax.f32 %v1496_v55, %v431_v60  ;;  %v952_v10 = vmin.f32 %v951_v1, %v430_v51  ;;  %v254_v44 = vld [vmem:[%s2896_s7 + $0xd8] sm:$0xff] }
  0x77   : > { %v1448_v16 = vmax.f32 %v1447_v7, %v383_v12  ;;  %v1312_v59 = vmax.f32 %v1311_v50, %v249_v53  ;;  %v768_v8 = vmin.f32 %v767_v63, %v249_v53 }
  0x78   : > { %v903_v22 = vmin.f32 %v902_v13, %v382_v3  ;;  %v1498_v9 = vmax.f32 %v1497_v0, %v432_v6  ;;  %v293_v13 = vld [vmem:[%s2896_s7 + $0x210] sm:$0xff]  ;;  %v953_v23 = vmin.f32 %v952_v10, %v431_v60 }
  0x79   : > { %v1449_v25 = vmax.f32 %v1448_v16, %v384_v21  ;;  %v1313_v4 = vmax.f32 %v1312_v59, %v250_v62  ;;  %v1358_v29 = vmax.f32 %v294_v24, %v293_v13  ;;  %v297_v60 = vld [vmem:[%s2896_s7 + $0x230] sm:$0xff] }
  0x7a   : > { %v904_v31 = vmin.f32 %v903_v22, %v383_v12  ;;  %v292_v12 = vld [vmem:[%s2896_s7 + $0x208] sm:$0xff]  ;;  %v1499_v22 = vmax.f32 %v1498_v9, %v433_v17  ;;  %v954_v35 = vmin.f32 %v953_v23, %v432_v6  ;;  %v437_v0 = vld [vmem:[%s2896_s7 + $0x690] sm:$0xff]  ;;  %v395_v9 = vld [vmem:[%s2896_s7 + $0x540] sm:$0xff] }
  0x7b   : > { %v1450_v34 = vmax.f32 %v1449_v25, %v385_v30  ;;  %v1314_v16 = vmax.f32 %v1313_v4, %v251_v5  ;;  %v812_v18 = vmin.f32 %v291_v11, %v292_v12  ;;  %v391_v25 = vld [vmem:[%s2896_s7 + $0x520] sm:$0xff]  ;;  %v1359_v41 = vmax.f32 %v1358_v29, %v295_v36  ;;  %v256_v4 = vld [vmem:[%s2896_s7 + $0xe8] sm:$0xff]  ;;  %v438_v12 = vld [vmem:[%s2896_s7 + $0x698] sm:$0xff] }
  0x7c   : > { %v905_v40 = vmin.f32 %v904_v31, %v384_v21  ;;  %v769_v21 = vmin.f32 %v768_v8, %v250_v62  ;;  %v955_v47 = vmin.f32 %v954_v35, %v433_v17  ;;  %v298_v8 = vld [vmem:[%s2896_s7 + $0x238] sm:$0xff] }
  0x7d   : > { %v1451_v43 = vmax.f32 %v1450_v34, %v386_v39  ;;  %v1315_v27 = vmax.f32 %v1314_v16, %v252_v20  ;;  %v1500_v34 = vmax.f32 %v1499_v22, %v434_v28  ;;  %v257_v16 = vld [vmem:[%s2896_s7 + $0xf0] sm:$0xff] }
  0x7e   : > { %v906_v49 = vmin.f32 %v905_v40, %v385_v30  ;;  %v813_v30 = vmin.f32 %v812_v18, %v293_v13  ;;  %v770_v33 = vmin.f32 %v769_v21, %v251_v5  ;;  %v435_v40 = vld [vmem:[%s2896_s7 + $0x680] sm:$0xff]  ;;  %v956_v59 = vmin.f32 %v955_v47, %v434_v28  ;;  %v396_v21 = vld [vmem:[%s2896_s7 + $0x548] sm:$0xff]  ;;  %v258_v28 = vld [vmem:[%s2896_s7 + $0xf8] sm:$0xff] }
  0x7f   : > { %v1452_v52 = vmax.f32 %v1451_v43, %v387_v48  ;;  %v1501_v46 = vmax.f32 %v1500_v34, %v435_v40 }
  0x80   : > { %v907_v58 = vmin.f32 %v906_v49, %v386_v39  ;;  %v1316_v39 = vmax.f32 %v1315_v27, %v253_v32  ;;  %v814_v42 = vmin.f32 %v813_v30, %v294_v24  ;;  %v771_v45 = vmin.f32 %v770_v33, %v252_v20  ;;  %v393_v49 = vld [vmem:[%s2896_s7 + $0x530] sm:$0xff]  ;;  %v299_v20 = vld [vmem:[%s2896_s7 + $0x240] sm:$0xff] }
  0x81   : > { %v1453_v61 = vmax.f32 %v1452_v52, %v388_v57  ;;  %v436_v52 = vld [vmem:[%s2896_s7 + $0x688] sm:$0xff]  ;;  %v439_v24 = vld [vmem:[%s2896_s7 + $0x6a0] sm:$0xff]  ;;  %v397_v33 = vld [vmem:[%s2896_s7 + $0x550] sm:$0xff] }
  0x82   : > { %v908_v3 = vmin.f32 %v907_v58, %v387_v48  ;;  %v296_v48 = vld [vmem:[%s2896_s7 + $0x228] sm:$0xff]  ;;  %v1317_v51 = vmax.f32 %v1316_v39, %v254_v44  ;;  %v815_v54 = vmin.f32 %v814_v42, %v295_v36  ;;  %v1502_v58 = vmax.f32 %v1501_v46, %v436_v52 }
  0x83   : > { %v1454_v7 = vmax.f32 %v1453_v61, %v389_v2  ;;  %v1360_v53 = vmax.f32 %v1359_v41, %v296_v48  ;;  %v394_v61 = vld [vmem:[%s2896_s7 + $0x538] sm:$0xff]  ;;  %v440_v36 = vld [vmem:[%s2896_s7 + $0x6a8] sm:$0xff] }
  0x84   : > { %v909_v15 = vmin.f32 %v908_v3, %v388_v57  ;;  %v772_v57 = vmin.f32 %v771_v45, %v253_v32  ;;  %v1318_v63 = vmax.f32 %v1317_v51, %v255_v56  ;;  %v1503_v6 = vmax.f32 %v1502_v58, %v437_v0  ;;  %v300_v32 = vld [vmem:[%s2896_s7 + $0x248] sm:$0xff]  ;;  %v398_v45 = vld [vmem:[%s2896_s7 + $0x558] sm:$0xff] }
  0x85   : > { %v1455_v19 = vmax.f32 %v1454_v7, %v390_v14  ;;  %v1361_v1 = vmax.f32 %v1360_v53, %v297_v60  ;;  %v957_v7 = vmin.f32 %v956_v59, %v435_v40  ;;  %v259_v40 = vld [vmem:[%s2896_s7 + $0x100] sm:$0xff] }
  0x86   : > { %v910_v26 = vmin.f32 %v909_v15, %v389_v2  ;;  %v816_v2 = vmin.f32 %v815_v54, %v296_v48  ;;  %v773_v5 = vmin.f32 %v772_v57, %v254_v44  ;;  %v1319_v11 = vmax.f32 %v1318_v63, %v256_v4  ;;  %v301_v44 = vld [vmem:[%s2896_s7 + $0x250] sm:$0xff]  ;;  %v399_v57 = vld [vmem:[%s2896_s7 + $0x560] sm:$0xff] }
  0x87   : > { %v1456_v31 = vmax.f32 %v1455_v19, %v391_v25  ;;  %v1362_v13 = vmax.f32 %v1361_v1, %v298_v8  ;;  %v1504_v18 = vmax.f32 %v1503_v6, %v438_v12  ;;  %v958_v19 = vmin.f32 %v957_v7, %v436_v52  ;;  %v441_v48 = vld [vmem:[%s2896_s7 + $0x6b0] sm:$0xff]  ;;  %v260_v52 = vld [vmem:[%s2896_s7 + $0x108] sm:$0xff] }
  0x88   : > { %v911_v38 = vmin.f32 %v910_v26, %v390_v14  ;;  %v817_v14 = vmin.f32 %v816_v2, %v297_v60  ;;  %v774_v17 = vmin.f32 %v773_v5, %v255_v56  ;;  %v1320_v23 = vmax.f32 %v1319_v11, %v257_v16  ;;  %v302_v56 = vld [vmem:[%s2896_s7 + $0x258] sm:$0xff]  ;;  %v400_v5 = vld [vmem:[%s2896_s7 + $0x568] sm:$0xff] }
  0x89   : > { %v1457_v43 = vmax.f32 %v1456_v31, %v392_v37  ;;  %v1505_v30 = vmax.f32 %v1504_v18, %v439_v24  ;;  %v959_v31 = vmin.f32 %v958_v19, %v437_v0  ;;  %v442_v60 = vld [vmem:[%s2896_s7 + $0x6b8] sm:$0xff]  ;;  %v261_v0 = vld [vmem:[%s2896_s7 + $0x110] sm:$0xff] }
  0x8a   : > { %v912_v50 = vmin.f32 %v911_v38, %v391_v25  ;;  %v1363_v25 = vmax.f32 %v1362_v13, %v299_v20  ;;  %v818_v26 = vmin.f32 %v817_v14, %v298_v8  ;;  %v775_v29 = vmin.f32 %v774_v17, %v256_v4  ;;  %v303_v4 = vld [vmem:[%s2896_s7 + $0x260] sm:$0xff]  ;;  %v401_v17 = vld [vmem:[%s2896_s7 + $0x570] sm:$0xff] }
  0x8b   : > { %v1458_v55 = vmax.f32 %v1457_v43, %v393_v49  ;;  %v1321_v35 = vmax.f32 %v1320_v23, %v258_v28  ;;  %v1506_v42 = vmax.f32 %v1505_v30, %v440_v36  ;;  %v960_v43 = vmin.f32 %v959_v31, %v438_v12  ;;  %v443_v8 = vld [vmem:[%s2896_s7 + $0x6c0] sm:$0xff]  ;;  %v262_v12 = vld [vmem:[%s2896_s7 + $0x118] sm:$0xff] }
  0x8c   : > { %v913_v62 = vmin.f32 %v912_v50, %v392_v37  ;;  %v1364_v37 = vmax.f32 %v1363_v25, %v300_v32  ;;  %v819_v38 = vmin.f32 %v818_v26, %v299_v20  ;;  %v776_v41 = vmin.f32 %v775_v29, %v257_v16  ;;  %v304_v16 = vld [vmem:[%s2896_s7 + $0x268] sm:$0xff]  ;;  %v402_v29 = vld [vmem:[%s2896_s7 + $0x578] sm:$0xff] }
  0x8d   : > { %v1459_v3 = vmax.f32 %v1458_v55, %v394_v61  ;;  %v1322_v47 = vmax.f32 %v1321_v35, %v259_v40  ;;  %v1507_v54 = vmax.f32 %v1506_v42, %v441_v48  ;;  %v961_v55 = vmin.f32 %v960_v43, %v439_v24  ;;  %v444_v20 = vld [vmem:[%s2896_s7 + $0x6c8] sm:$0xff]  ;;  %v263_v24 = vld [vmem:[%s2896_s7 + $0x120] sm:$0xff] }
  0x8e   : > { %v914_v10 = vmin.f32 %v913_v62, %v393_v49  ;;  %v1365_v49 = vmax.f32 %v1364_v37, %v301_v44  ;;  %v820_v50 = vmin.f32 %v819_v38, %v300_v32  ;;  %v777_v53 = vmin.f32 %v776_v41, %v258_v28  ;;  %v305_v28 = vld [vmem:[%s2896_s7 + $0x270] sm:$0xff]  ;;  %v403_v41 = vld [vmem:[%s2896_s7 + $0x580] sm:$0xff] }
  0x8f   : > { %v1460_v15 = vmax.f32 %v1459_v3, %v395_v9  ;;  %v1323_v59 = vmax.f32 %v1322_v47, %v260_v52  ;;  %v1508_v2 = vmax.f32 %v1507_v54, %v442_v60  ;;  %v962_v3 = vmin.f32 %v961_v55, %v440_v36  ;;  %v445_v32 = vld [vmem:[%s2896_s7 + $0x6d0] sm:$0xff]  ;;  %v264_v36 = vld [vmem:[%s2896_s7 + $0x128] sm:$0xff] }
  0x90   : > { %v915_v22 = vmin.f32 %v914_v10, %v394_v61  ;;  %v1366_v61 = vmax.f32 %v1365_v49, %v302_v56  ;;  %v821_v62 = vmin.f32 %v820_v50, %v301_v44  ;;  %v778_v1 = vmin.f32 %v777_v53, %v259_v40  ;;  %v306_v40 = vld [vmem:[%s2896_s7 + $0x278] sm:$0xff]  ;;  %v404_v53 = vld [vmem:[%s2896_s7 + $0x588] sm:$0xff] }
  0x91   : > { %v1461_v27 = vmax.f32 %v1460_v15, %v396_v21  ;;  %v1324_v7 = vmax.f32 %v1323_v59, %v261_v0  ;;  %v1509_v14 = vmax.f32 %v1508_v2, %v443_v8  ;;  %v963_v15 = vmin.f32 %v962_v3, %v441_v48  ;;  %v446_v44 = vld [vmem:[%s2896_s7 + $0x6d8] sm:$0xff]  ;;  %v265_v48 = vld [vmem:[%s2896_s7 + $0x130] sm:$0xff] }
  0x92   : > { %v916_v34 = vmin.f32 %v915_v22, %v395_v9  ;;  %v1367_v9 = vmax.f32 %v1366_v61, %v303_v4  ;;  %v822_v10 = vmin.f32 %v821_v62, %v302_v56  ;;  %v779_v13 = vmin.f32 %v778_v1, %v260_v52  ;;  %v307_v52 = vld [vmem:[%s2896_s7 + $0x280] sm:$0xff]  ;;  %v405_v1 = vld [vmem:[%s2896_s7 + $0x590] sm:$0xff] }
  0x93   : > { %v1462_v39 = vmax.f32 %v1461_v27, %v397_v33  ;;  %v1325_v19 = vmax.f32 %v1324_v7, %v262_v12  ;;  %v1510_v26 = vmax.f32 %v1509_v14, %v444_v20  ;;  %v964_v27 = vmin.f32 %v963_v15, %v442_v60  ;;  %v447_v56 = vld [vmem:[%s2896_s7 + $0x6e0] sm:$0xff]  ;;  %v266_v60 = vld [vmem:[%s2896_s7 + $0x138] sm:$0xff] }
  0x94   : > { %v917_v46 = vmin.f32 %v916_v34, %v396_v21  ;;  %v1368_v21 = vmax.f32 %v1367_v9, %v304_v16  ;;  %v823_v22 = vmin.f32 %v822_v10, %v303_v4  ;;  %v780_v25 = vmin.f32 %v779_v13, %v261_v0  ;;  %v308_v0 = vld [vmem:[%s2896_s7 + $0x288] sm:$0xff]  ;;  %v406_v13 = vld [vmem:[%s2896_s7 + $0x598] sm:$0xff] }
  0x95   : > { %v1463_v51 = vmax.f32 %v1462_v39, %v398_v45  ;;  %v1326_v31 = vmax.f32 %v1325_v19, %v263_v24  ;;  %v1511_v38 = vmax.f32 %v1510_v26, %v445_v32  ;;  %v965_v39 = vmin.f32 %v964_v27, %v443_v8  ;;  %v448_v4 = vld [vmem:[%s2896_s7 + $0x6e8] sm:$0xff]  ;;  %v267_v8 = vld [vmem:[%s2896_s7 + $0x140] sm:$0xff] }
  0x96   : > { %v918_v58 = vmin.f32 %v917_v46, %v397_v33  ;;  %v1369_v33 = vmax.f32 %v1368_v21, %v305_v28  ;;  %v824_v34 = vmin.f32 %v823_v22, %v304_v16  ;;  %v781_v37 = vmin.f32 %v780_v25, %v262_v12  ;;  %v309_v12 = vld [vmem:[%s2896_s7 + $0x290] sm:$0xff]  ;;  %v407_v25 = vld [vmem:[%s2896_s7 + $0x5a0] sm:$0xff] }
  0x97   : > { %v1464_v63 = vmax.f32 %v1463_v51, %v399_v57  ;;  %v1327_v43 = vmax.f32 %v1326_v31, %v264_v36  ;;  %v1512_v50 = vmax.f32 %v1511_v38, %v446_v44  ;;  %v966_v51 = vmin.f32 %v965_v39, %v444_v20  ;;  %v449_v16 = vld [vmem:[%s2896_s7 + $0x6f0] sm:$0xff]  ;;  %v268_v20 = vld [vmem:[%s2896_s7 + $0x148] sm:$0xff] }
  0x98   : > { %v919_v6 = vmin.f32 %v918_v58, %v398_v45  ;;  %v1370_v45 = vmax.f32 %v1369_v33, %v306_v40  ;;  %v825_v46 = vmin.f32 %v824_v34, %v305_v28  ;;  %v782_v49 = vmin.f32 %v781_v37, %v263_v24  ;;  %v310_v24 = vld [vmem:[%s2896_s7 + $0x298] sm:$0xff]  ;;  %v408_v37 = vld [vmem:[%s2896_s7 + $0x5a8] sm:$0xff] }
  0x99   : > { %v1465_v11 = vmax.f32 %v1464_v63, %v400_v5  ;;  %v1328_v55 = vmax.f32 %v1327_v43, %v265_v48  ;;  %v1513_v62 = vmax.f32 %v1512_v50, %v447_v56  ;;  %v967_v63 = vmin.f32 %v966_v51, %v445_v32  ;;  %v450_v28 = vld [vmem:[%s2896_s7 + $0x6f8] sm:$0xff]  ;;  %v269_v32 = vld [vmem:[%s2896_s7 + $0x150] sm:$0xff] }
  0x9a   : > { %v920_v18 = vmin.f32 %v919_v6, %v399_v57  ;;  %v1371_v57 = vmax.f32 %v1370_v45, %v307_v52  ;;  %v826_v58 = vmin.f32 %v825_v46, %v306_v40  ;;  %v783_v61 = vmin.f32 %v782_v49, %v264_v36  ;;  %v311_v36 = vld [vmem:[%s2896_s7 + $0x2a0] sm:$0xff]  ;;  %v409_v49 = vld [vmem:[%s2896_s7 + $0x5b0] sm:$0xff] }
  0x9b   : > { %v1466_v23 = vmax.f32 %v1465_v11, %v401_v17  ;;  %v1329_v3 = vmax.f32 %v1328_v55, %v266_v60  ;;  %v1514_v10 = vmax.f32 %v1513_v62, %v448_v4  ;;  %v968_v11 = vmin.f32 %v967_v63, %v446_v44  ;;  %v451_v40 = vld [vmem:[%s2896_s7 + $0x700] sm:$0xff]  ;;  %v270_v44 = vld [vmem:[%s2896_s7 + $0x158] sm:$0xff] }
  0x9c   : > { %v921_v30 = vmin.f32 %v920_v18, %v400_v5  ;;  %v1372_v5 = vmax.f32 %v1371_v57, %v308_v0  ;;  %v827_v6 = vmin.f32 %v826_v58, %v307_v52  ;;  %v784_v9 = vmin.f32 %v783_v61, %v265_v48  ;;  %v312_v48 = vld [vmem:[%s2896_s7 + $0x2a8] sm:$0xff]  ;;  %v410_v61 = vld [vmem:[%s2896_s7 + $0x5b8] sm:$0xff] }
  0x9d   : > { %v1467_v35 = vmax.f32 %v1466_v23, %v402_v29  ;;  %v1330_v15 = vmax.f32 %v1329_v3, %v267_v8  ;;  %v1515_v22 = vmax.f32 %v1514_v10, %v449_v16  ;;  %v969_v23 = vmin.f32 %v968_v11, %v447_v56  ;;  %v452_v52 = vld [vmem:[%s2896_s7 + $0x708] sm:$0xff]  ;;  %v271_v56 = vld [vmem:[%s2896_s7 + $0x160] sm:$0xff] }
  0x9e   : > { %v922_v42 = vmin.f32 %v921_v30, %v401_v17  ;;  %v1373_v17 = vmax.f32 %v1372_v5, %v309_v12  ;;  %v828_v18 = vmin.f32 %v827_v6, %v308_v0  ;;  %v785_v21 = vmin.f32 %v784_v9, %v266_v60  ;;  %v313_v60 = vld [vmem:[%s2896_s7 + $0x2b0] sm:$0xff]  ;;  %v411_v9 = vld [vmem:[%s2896_s7 + $0x5c0] sm:$0xff] }
  0x9f   : > { %v1468_v47 = vmax.f32 %v1467_v35, %v403_v41  ;;  %v1331_v27 = vmax.f32 %v1330_v15, %v268_v20  ;;  %v1516_v34 = vmax.f32 %v1515_v22, %v450_v28  ;;  %v970_v35 = vmin.f32 %v969_v23, %v448_v4  ;;  %v453_v0 = vld [vmem:[%s2896_s7 + $0x710] sm:$0xff]  ;;  %v272_v4 = vld [vmem:[%s2896_s7 + $0x168] sm:$0xff] }
  0xa0   : > { %v923_v54 = vmin.f32 %v922_v42, %v402_v29  ;;  %v1374_v29 = vmax.f32 %v1373_v17, %v310_v24  ;;  %v829_v30 = vmin.f32 %v828_v18, %v309_v12  ;;  %v786_v33 = vmin.f32 %v785_v21, %v267_v8  ;;  %v314_v8 = vld [vmem:[%s2896_s7 + $0x2b8] sm:$0xff]  ;;  %v412_v21 = vld [vmem:[%s2896_s7 + $0x5c8] sm:$0xff] }
  0xa1   : > { %v1469_v59 = vmax.f32 %v1468_v47, %v404_v53  ;;  %v1332_v39 = vmax.f32 %v1331_v27, %v269_v32  ;;  %v1517_v46 = vmax.f32 %v1516_v34, %v451_v40  ;;  %v971_v47 = vmin.f32 %v970_v35, %v449_v16  ;;  %v454_v12 = vld [vmem:[%s2896_s7 + $0x718] sm:$0xff]  ;;  %v273_v16 = vld [vmem:[%s2896_s7 + $0x170] sm:$0xff] }
  0xa2   : > { %v924_v2 = vmin.f32 %v923_v54, %v403_v41  ;;  %v1375_v41 = vmax.f32 %v1374_v29, %v311_v36  ;;  %v830_v42 = vmin.f32 %v829_v30, %v310_v24  ;;  %v787_v45 = vmin.f32 %v786_v33, %v268_v20  ;;  %v315_v20 = vld [vmem:[%s2896_s7 + $0x2c0] sm:$0xff]  ;;  %v413_v33 = vld [vmem:[%s2896_s7 + $0x5d0] sm:$0xff] }
  0xa3   : > { %v1470_v7 = vmax.f32 %v1469_v59, %v405_v1  ;;  %v1333_v51 = vmax.f32 %v1332_v39, %v270_v44  ;;  %v1518_v58 = vmax.f32 %v1517_v46, %v452_v52  ;;  %v972_v59 = vmin.f32 %v971_v47, %v450_v28  ;;  %v455_v24 = vld [vmem:[%s2896_s7 + $0x720] sm:$0xff]  ;;  %v274_v28 = vld [vmem:[%s2896_s7 + $0x178] sm:$0xff] }
  0xa4   : > { %v925_v14 = vmin.f32 %v924_v2, %v404_v53  ;;  %v1376_v53 = vmax.f32 %v1375_v41, %v312_v48  ;;  %v831_v54 = vmin.f32 %v830_v42, %v311_v36  ;;  %v788_v57 = vmin.f32 %v787_v45, %v269_v32  ;;  %v316_v32 = vld [vmem:[%s2896_s7 + $0x2c8] sm:$0xff]  ;;  %v414_v45 = vld [vmem:[%s2896_s7 + $0x5d8] sm:$0xff] }
  0xa5   : > { %v1471_v19 = vmax.f32 %v1470_v7, %v406_v13  ;;  %v1334_v63 = vmax.f32 %v1333_v51, %v271_v56  ;;  %v1519_v6 = vmax.f32 %v1518_v58, %v453_v0  ;;  %v973_v7 = vmin.f32 %v972_v59, %v451_v40  ;;  %v456_v36 = vld [vmem:[%s2896_s7 + $0x728] sm:$0xff]  ;;  %v275_v40 = vld [vmem:[%s2896_s7 + $0x180] sm:$0xff] }
  0xa6   : > { %v926_v26 = vmin.f32 %v925_v14, %v405_v1  ;;  %v1377_v1 = vmax.f32 %v1376_v53, %v313_v60  ;;  %v832_v2 = vmin.f32 %v831_v54, %v312_v48  ;;  %v789_v5 = vmin.f32 %v788_v57, %v270_v44  ;;  %v317_v44 = vld [vmem:[%s2896_s7 + $0x2d0] sm:$0xff]  ;;  %v415_v57 = vld [vmem:[%s2896_s7 + $0x5e0] sm:$0xff] }
  0xa7   : > { %v1472_v31 = vmax.f32 %v1471_v19, %v407_v25  ;;  %v1335_v11 = vmax.f32 %v1334_v63, %v272_v4  ;;  %v1520_v18 = vmax.f32 %v1519_v6, %v454_v12  ;;  %v974_v19 = vmin.f32 %v973_v7, %v452_v52  ;;  %v457_v48 = vld [vmem:[%s2896_s7 + $0x730] sm:$0xff]  ;;  %v276_v52 = vld [vmem:[%s2896_s7 + $0x188] sm:$0xff] }
  0xa8   : > { %v927_v38 = vmin.f32 %v926_v26, %v406_v13  ;;  %v1378_v13 = vmax.f32 %v1377_v1, %v314_v8  ;;  %v833_v14 = vmin.f32 %v832_v2, %v313_v60  ;;  %v790_v17 = vmin.f32 %v789_v5, %v271_v56  ;;  %v318_v56 = vld [vmem:[%s2896_s7 + $0x2d8] sm:$0xff]  ;;  %v416_v5 = vld [vmem:[%s2896_s7 + $0x5e8] sm:$0xff] }
  0xa9   : > { %v1473_v43 = vmax.f32 %v1472_v31, %v408_v37  ;;  %v1336_v23 = vmax.f32 %v1335_v11, %v273_v16  ;;  %v1521_v30 = vmax.f32 %v1520_v18, %v455_v24  ;;  %v975_v31 = vmin.f32 %v974_v19, %v453_v0  ;;  %v458_v60 = vld [vmem:[%s2896_s7 + $0x738] sm:$0xff]  ;;  %v277_v0 = vld [vmem:[%s2896_s7 + $0x190] sm:$0xff] }
  0xaa   : > { %v928_v50 = vmin.f32 %v927_v38, %v407_v25  ;;  %v1379_v25 = vmax.f32 %v1378_v13, %v315_v20  ;;  %v834_v26 = vmin.f32 %v833_v14, %v314_v8  ;;  %v791_v29 = vmin.f32 %v790_v17, %v272_v4  ;;  %v319_v4 = vld [vmem:[%s2896_s7 + $0x2e0] sm:$0xff]  ;;  %v417_v17 = vld [vmem:[%s2896_s7 + $0x5f0] sm:$0xff] }
  0xab   : > { %v1474_v55 = vmax.f32 %v1473_v43, %v409_v49  ;;  %v1337_v35 = vmax.f32 %v1336_v23, %v274_v28  ;;  %v1522_v42 = vmax.f32 %v1521_v30, %v456_v36  ;;  %v976_v43 = vmin.f32 %v975_v31, %v454_v12  ;;  %v459_v8 = vld [vmem:[%s2896_s7 + $0x740] sm:$0xff]  ;;  %v278_v12 = vld [vmem:[%s2896_s7 + $0x198] sm:$0xff] }
  0xac   : > { %v929_v62 = vmin.f32 %v928_v50, %v408_v37  ;;  %v1380_v37 = vmax.f32 %v1379_v25, %v316_v32  ;;  %v835_v38 = vmin.f32 %v834_v26, %v315_v20  ;;  %v792_v41 = vmin.f32 %v791_v29, %v273_v16  ;;  %v320_v16 = vld [vmem:[%s2896_s7 + $0x2e8] sm:$0xff]  ;;  %v3094_v29 = vld [vmem:[%s2896_s7 + $0x5f8] sm:$0xff] }
  0xad   : > { %v1475_v3 = vmax.f32 %v1474_v55, %v410_v61  ;;  %v1338_v47 = vmax.f32 %v1337_v35, %v275_v40  ;;  %v1523_v54 = vmax.f32 %v1522_v42, %v457_v48  ;;  %v977_v55 = vmin.f32 %v976_v43, %v455_v24  ;;  %v460_v20 = vld [vmem:[%s2896_s7 + $0x748] sm:$0xff]  ;;  %v279_v24 = vld [vmem:[%s2896_s7 + $0x1a0] sm:$0xff] }
  0xae   : > { %v930_v10 = vmin.f32 %v929_v62, %v409_v49  ;;  %v1381_v49 = vmax.f32 %v1380_v37, %v317_v44  ;;  %v836_v50 = vmin.f32 %v835_v38, %v316_v32  ;;  %v793_v53 = vmin.f32 %v792_v41, %v274_v28  ;;  %v321_v28 = vld [vmem:[%s2896_s7 + $0x2f0] sm:$0xff]  ;;  %v322_v41 = vld [vmem:[%s2896_s7 + $0x2f8] sm:$0xff] }
  0xaf   : > { %v1476_v15 = vmax.f32 %v1475_v3, %v411_v9  ;;  %v1339_v59 = vmax.f32 %v1338_v47, %v276_v52  ;;  %v1524_v2 = vmax.f32 %v1523_v54, %v458_v60  ;;  %v978_v3 = vmin.f32 %v977_v55, %v456_v36  ;;  %v461_v32 = vld [vmem:[%s2896_s7 + $0x750] sm:$0xff]  ;;  %v280_v36 = vld [vmem:[%s2896_s7 + $0x1a8] sm:$0xff] }
  0xb0   : > { %v931_v22 = vmin.f32 %v930_v10, %v410_v61  ;;  %v1382_v61 = vmax.f32 %v1381_v49, %v318_v56  ;;  %v837_v62 = vmin.f32 %v836_v50, %v317_v44  ;;  %v794_v1 = vmin.f32 %v793_v53, %v275_v40  ;;  %v281_v37 = vld [vmem:[%s2896_s7 + $0x1b0] sm:$0xff]  ;;  %v462_v44 = vld [vmem:[%s2896_s7 + $0x758] sm:$0xff]  ;;  %v547_v53 = vld [vmem:[%s2896_s7 + $0xa00] sm:$0xff] }
  0xb1   : > { %v1477_v27 = vmax.f32 %v1476_v15, %v412_v21  ;;  %v1340_v7 = vmax.f32 %v1339_v59, %v277_v0  ;;  %v1525_v14 = vmax.f32 %v1524_v2, %v459_v8  ;;  %v979_v15 = vmin.f32 %v978_v3, %v457_v48  ;;  %v549_v47 = vld [vmem:[%s2896_s7 + $0xa10] sm:$0xff]  ;;  %v3105_v48 = vld [vmem:[%s2896_s7 + $0xa18] sm:$0xff]  ;;  %v548_v54 = vld [vmem:[%s2896_s7 + $0xa08] sm:$0xff] }
  0xb2   : > { %v932_v34 = vmin.f32 %v931_v22, %v411_v9  ;;  %v1383_v9 = vmax.f32 %v1382_v61, %v319_v4  ;;  %v838_v10 = vmin.f32 %v837_v62, %v318_v56  ;;  %v795_v13 = vmin.f32 %v794_v1, %v276_v52  ;;  %v323_v52 = vld [vmem:[%s2896_s7 + $0x300] sm:$0xff]  ;;  %v282_v62 = vld [vmem:[%s2896_s7 + $0x1b8] sm:$0xff]  ;;  %v324_v2 = vld [vmem:[%s2896_s7 + $0x308] sm:$0xff] }
  0xb3   : > { %v1478_v39 = vmax.f32 %v1477_v27, %v413_v33  ;;  %v1341_v19 = vmax.f32 %v1340_v7, %v278_v12  ;;  %v1526_v26 = vmax.f32 %v1525_v14, %v460_v20  ;;  %v980_v27 = vmin.f32 %v979_v15, %v458_v60  ;;  %v551_v61 = vld [vmem:[%s2896_s7 + $0xa20] sm:$0xff]  ;;  %v325_v14 = vld [vmem:[%s2896_s7 + $0x310] sm:$0xff] }
  0xb4   : > { %v933_v46 = vmin.f32 %v932_v34, %v412_v21  ;;  %v1384_v21 = vmax.f32 %v1383_v9, %v320_v16  ;;  %v839_v22 = vmin.f32 %v838_v10, %v319_v4  ;;  %v796_v25 = vmin.f32 %v795_v13, %v277_v0  ;;  %v283_v10 = vld [vmem:[%s2896_s7 + $0x1c0] sm:$0xff] }
  0xb5   : > { %v1479_v51 = vmax.f32 %v1478_v39, %v414_v45  ;;  %v1342_v31 = vmax.f32 %v1341_v19, %v279_v24  ;;  %v1527_v39 = vmax.f32 %v1526_v26, %v461_v32  ;;  %v981_v40 = vmin.f32 %v980_v27, %v459_v8  ;;  %v552_v8 = vld [vmem:[%s2896_s7 + $0xa28] sm:$0xff]  ;;  %v326_v27 = vld [vmem:[%s2896_s7 + $0x318] sm:$0xff] }
  0xb6   : > { %v934_v58 = vmin.f32 %v933_v46, %v413_v33  ;;  %v1385_v33 = vmax.f32 %v1384_v21, %v321_v28  ;;  %v840_v34 = vmin.f32 %v839_v22, %v320_v16  ;;  %v797_v38 = vmin.f32 %v796_v25, %v278_v12  ;;  %v284_v22 = vld [vmem:[%s2896_s7 + $0x1c8] sm:$0xff] }
  0xb7   : > { %v1480_v63 = vmax.f32 %v1479_v51, %v415_v57  ;;  %v1343_v43 = vmax.f32 %v1342_v31, %v280_v36  ;;  %v1528_v50 = vmax.f32 %v1527_v39, %v462_v44  ;;  %v982_v51 = vmin.f32 %v981_v40, %v460_v20  ;;  %v553_v20 = vld [vmem:[%s2896_s7 + $0xa30] sm:$0xff]  ;;  %v466_v31 = vld [vmem:[%s2896_s7 + $0x778] sm:$0xff] }
  0xb8   : > { %v935_v6 = vmin.f32 %v934_v58, %v414_v45  ;;  %v1386_v45 = vmax.f32 %v1385_v33, %v322_v41  ;;  %v841_v46 = vmin.f32 %v840_v34, %v321_v28  ;;  %v798_v49 = vmin.f32 %v797_v38, %v279_v24  ;;  %v463_v58 = vld [vmem:[%s2896_s7 + $0x760] sm:$0xff]  ;;  %v554_v34 = vld [vmem:[%s2896_s7 + $0xa38] sm:$0xff] }
  0xb9   : > { %v1481_v11 = vmax.f32 %v1480_v63, %v416_v5  ;;  %v1618_v55 = vmax.f32 %v3105_v48, %v549_v47  ;;  %v1529_v0 = vmax.f32 %v1528_v50, %v463_v58  ;;  %v983_v1 = vmin.f32 %v982_v51, %v461_v32  ;;  %v286_v50 = vld [vmem:[%s2896_s7 + $0x1d8] sm:$0xff] }
  0xba   : > { %v936_v18 = vmin.f32 %v935_v6, %v415_v57  ;;  %v1344_v57 = vmax.f32 %v1343_v43, %v281_v37  ;;  %v1387_v59 = vmax.f32 %v1386_v45, %v323_v52  ;;  %v842_v60 = vmin.f32 %v841_v46, %v322_v41  ;;  %v327_v41 = vld [vmem:[%s2896_s7 + $0x320] sm:$0xff] }
  0xbb   : > { %v3089_v23 = vmax.f32 %v1481_v11, %v417_v17  ;;  %v799_v63 = vmin.f32 %v798_v49, %v280_v36  ;;  %v1619_v3 = vmax.f32 %v1618_v55, %v551_v61  ;;  %v1072_v9 = vmin.f32 %v547_v53, %v548_v54  ;;  %v328_v53 = vld [vmem:[%s2896_s7 + $0x328] sm:$0xff] }
  0xbc   : > { %v937_v30 = vmin.f32 %v936_v18, %v416_v5  ;;  %v1345_v4 = vmax.f32 %v1344_v57, %v282_v62  ;;  %v464_v5 = vld [vmem:[%s2896_s7 + $0x768] sm:$0xff]  ;;  %v1388_v6 = vmax.f32 %v1387_v59, %v324_v2  ;;  %v843_v7 = vmin.f32 %v842_v60, %v323_v52 }
  0xbd   : > { %v1483_v35 = vmax.f32 %v3089_v23, %v3094_v29  ;;  %v800_v11 = vmin.f32 %v799_v63, %v281_v37  ;;  %v1530_v12 = vmax.f32 %v1529_v0, %v464_v5  ;;  %v984_v13 = vmin.f32 %v983_v1, %v462_v44  ;;  %v285_v37 = vld [vmem:[%s2896_s7 + $0x1d0] sm:$0xff]  ;;  %v467_v44 = vld [vmem:[%s2896_s7 + $0x780] sm:$0xff]  ;;  %v556_v59 = vld [vmem:[%s2896_s7 + $0xa48] sm:$0xff] }
  0xbe   : > { %v938_v42 = vmin.f32 %v937_v30, %v417_v17  ;;  %v1620_v15 = vmax.f32 %v1619_v3, %v552_v8  ;;  %v1346_v16 = vmax.f32 %v1345_v4, %v283_v10  ;;  %v465_v17 = vld [vmem:[%s2896_s7 + $0x770] sm:$0xff]  ;;  %v1389_v18 = vmax.f32 %v1388_v6, %v325_v14 }
  0xbf   : > { %v844_v19 = vmin.f32 %v843_v7, %v324_v2  ;;  %v1073_v21 = vmin.f32 %v1072_v9, %v549_v47  ;;  %v801_v24 = vmin.f32 %v800_v11, %v282_v62  ;;  %v1531_v25 = vmax.f32 %v1530_v12, %v465_v17  ;;  %v555_v47 = vld [vmem:[%s2896_s7 + $0xa40] sm:$0xff]  ;;  %v329_v1 = vld [vmem:[%s2896_s7 + $0x330] sm:$0xff] }
  0xc0   : > { %v939_v56 = vmin.f32 %v938_v42, %v3094_v29  ;;  %v985_v26 = vmin.f32 %v984_v13, %v463_v58  ;;  %v1621_v28 = vmax.f32 %v1620_v15, %v553_v20  ;;  %v1347_v30 = vmax.f32 %v1346_v16, %v284_v22  ;;  %v287_v62 = vld [vmem:[%s2896_s7 + $0x1e0] sm:$0xff]  ;;  %v469_v4 = vld [vmem:[%s2896_s7 + $0x790] sm:$0xff]  ;;  %v330_v13 = vld [vmem:[%s2896_s7 + $0x338] sm:$0xff] }
  0xc1   : > { %v1390_v32 = vmax.f32 %v1389_v18, %v326_v27  ;;  %v845_v33 = vmin.f32 %v844_v19, %v325_v14  ;;  %v1074_v36 = vmin.f32 %v1073_v21, %v3105_v48  ;;  %v802_v38 = vmin.f32 %v801_v24, %v283_v10  ;;  %v557_v7 = vld [vmem:[%s2896_s7 + $0xa50] sm:$0xff]  ;;  %v288_v10 = vld [vmem:[%s2896_s7 + $0x1e8] sm:$0xff]  ;;  %v470_v16 = vld [vmem:[%s2896_s7 + $0x798] sm:$0xff] }
  0xc2   : > { %940 = vmin.xlane.f32.xlu1 %v939_v56  ;;  %v1532_v39 = vmax.f32 %v1531_v25, %v466_v31  ;;  %v986_v40 = vmin.f32 %v985_v26, %v464_v5  ;;  %v1622_v42 = vmax.f32 %v1621_v28, %v554_v34  ;;  %v1348_v43 = vmax.f32 %v1347_v30, %v285_v37  ;;  %v468_v56 = vld [vmem:[%s2896_s7 + $0x788] sm:$0xff]  ;;  %v3143_v19 = vld [vmem:[%s2896_s7 + $0xa58] sm:$0xff]  ;;  %v331_v26 = vld [vmem:[%s2896_s7 + $0x340] sm:$0xff] }
  0xc3   : > { %v1391_v45 = vmax.f32 %v1390_v32, %v327_v41  ;;  %v846_v46 = vmin.f32 %v845_v33, %v326_v27  ;;  %v1075_v49 = vmin.f32 %v1074_v36, %v551_v61  ;;  %v803_v51 = vmin.f32 %v802_v38, %v284_v22  ;;  %v289_v22 = vld [vmem:[%s2896_s7 + $0x1f0] sm:$0xff]  ;;  %v471_v30 = vld [vmem:[%s2896_s7 + $0x7a0] sm:$0xff] }
  0xc4   : > { %v1533_v48 = vmax.f32 %v1532_v39, %v467_v44  ;;  %v987_v52 = vmin.f32 %v986_v40, %v465_v17  ;;  %v1623_v54 = vmax.f32 %v1622_v42, %v555_v47  ;;  %v1349_v55 = vmax.f32 %v1348_v43, %v286_v50  ;;  %v559_v33 = vld [vmem:[%s2896_s7 + $0xa60] sm:$0xff]  ;;  %v332_v40 = vld [vmem:[%s2896_s7 + $0x348] sm:$0xff] }
  0xc5   : > { %v1392_v57 = vmax.f32 %v1391_v45, %v328_v53  ;;  %v847_v58 = vmin.f32 %v846_v46, %v327_v41  ;;  %v1076_v60 = vmin.f32 %v1075_v49, %v552_v8  ;;  %v804_v63 = vmin.f32 %v803_v51, %v285_v37  ;;  %v3153_v37 = vld [vmem:[%s2896_s7 + $0x1f8] sm:$0xff]  ;;  %v472_v43 = vld [vmem:[%s2896_s7 + $0x7a8] sm:$0xff] }
  0xc6   : > { %v1534_v61 = vmax.f32 %v1533_v48, %v468_v56  ;;  %v988_v0 = vmin.f32 %v987_v52, %v466_v31  ;;  %v1624_v2 = vmax.f32 %v1623_v54, %v556_v59  ;;  %v1350_v3 = vmax.f32 %v1349_v55, %v287_v62  ;;  %v333_v52 = vld [vmem:[%s2896_s7 + $0x350] sm:$0xff]  ;;  %v3167_v55 = vld [vmem:[%s2896_s7 + $0x818] sm:$0xff] }
  0xc7   : > { %v1393_v5 = vmax.f32 %v1392_v57, %v329_v1  ;;  %v848_v6 = vmin.f32 %v847_v58, %v328_v53  ;;  %v1077_v9 = vmin.f32 %v1076_v60, %v553_v20  ;;  %v805_v11 = vmin.f32 %v804_v63, %v286_v50  ;;  %v485_v54 = vld [vmem:[%s2896_s7 + $0x810] sm:$0xff]  ;;  %v484_v63 = vld [vmem:[%s2896_s7 + $0x808] sm:$0xff] }
  0xc8   : > { %v1535_v8 = vmax.f32 %v1534_v61, %v469_v4  ;;  %v989_v12 = vmin.f32 %v988_v0, %v467_v44  ;;  %v1625_v14 = vmax.f32 %v1624_v2, %v557_v7  ;;  %v1351_v15 = vmax.f32 %v1350_v3, %v288_v10  ;;  %v473_v44 = vld [vmem:[%s2896_s7 + $0x7b0] sm:$0xff]  ;;  %v334_v2 = vld [vmem:[%s2896_s7 + $0x358] sm:$0xff] }
  0xc9   : > { %v1394_v17 = vmax.f32 %v1393_v5, %v330_v13  ;;  %v849_v18 = vmin.f32 %v848_v6, %v329_v1  ;;  %v1078_v21 = vmin.f32 %v1077_v9, %v554_v34  ;;  %v806_v20 = vmin.f32 %v805_v11, %v287_v62  ;;  %v561_v58 = vld [vmem:[%s2896_s7 + $0xa70] sm:$0xff]  ;;  %v483_v62 = vld [vmem:[%s2896_s7 + $0x800] sm:$0xff]  ;;  %v474_v5 = vld [vmem:[%s2896_s7 + $0x7b8] sm:$0xff] }
  0xca   : > { %v1536_v24 = vmax.f32 %v1535_v8, %v470_v16  ;;  %v990_v25 = vmin.f32 %v989_v12, %v468_v56  ;;  %v1626_v27 = vmax.f32 %v1625_v14, %v3143_v19  ;;  %v3148_v28 = vmax.f32 %v1351_v15, %v289_v22  ;;  %v488_v15 = vld [vmem:[%s2896_s7 + $0x828] sm:$0xff] }
  0xcb   : > { %v1395_v31 = vmax.f32 %v1394_v17, %v331_v26  ;;  %v850_v32 = vmin.f32 %v849_v18, %v330_v13  ;;  %v1079_v36 = vmin.f32 %v1078_v21, %v555_v47  ;;  %v807_v34 = vmin.f32 %v806_v20, %v288_v10  ;;  %v3161_v47 = vld [vmem:[%s2896_s7 + $0xa68] sm:$0xff]  ;;  %v3178_v10 = vld [vmem:[%s2896_s7 + $0xa78] sm:$0xff]  ;;  %v335_v13 = vld [vmem:[%s2896_s7 + $0x360] sm:$0xff] }
  0xcc   : > { %v1537_v38 = vmax.f32 %v1536_v24, %v471_v30  ;;  %v991_v39 = vmin.f32 %v990_v25, %v469_v4  ;;  %v1627_v41 = vmax.f32 %v1626_v27, %v559_v33  ;;  %v1353_v42 = vmax.f32 %v3148_v28, %v3153_v37  ;;  %v487_v4 = vld [vmem:[%s2896_s7 + $0x820] sm:$0xff] }
  0xcd   : > { %v1396_v45 = vmax.f32 %v1395_v31, %v332_v40  ;;  %v851_v46 = vmin.f32 %v850_v32, %v331_v26  ;;  %v1080_v49 = vmin.f32 %v1079_v36, %v556_v59  ;;  %v808_v50 = vmin.f32 %v807_v34, %v289_v22  ;;  %v475_v17 = vld [vmem:[%s2896_s7 + $0x7c0] sm:$0xff]  ;;  %v336_v26 = vld [vmem:[%s2896_s7 + $0x368] sm:$0xff] }
  0xce   : > { %v1538_v51 = vmax.f32 %v1537_v38, %v472_v43  ;;  %v992_v48 = vmin.f32 %v991_v39, %v470_v16  ;;  %v1628_v53 = vmax.f32 %v1627_v41, %v3161_v47  ;;  %v1553_v59 = vmax.f32 %v3167_v55, %v485_v54  ;;  %v563_v22 = vld [vmem:[%s2896_s7 + $0xa80] sm:$0xff]  ;;  %v476_v32 = vld [vmem:[%s2896_s7 + $0x7c8] sm:$0xff] }
  0xcf   : > { %v1397_v56 = vmax.f32 %v1396_v45, %v333_v52  ;;  %v852_v57 = vmin.f32 %v851_v46, %v332_v40  ;;  %v1081_v60 = vmin.f32 %v1080_v49, %v557_v7  ;;  %v809_v61 = vmin.f32 %v808_v50, %v3153_v37  ;;  %v564_v38 = vld [vmem:[%s2896_s7 + $0xa88] sm:$0xff]  ;;  %v490_v45 = vld [vmem:[%s2896_s7 + $0x838] sm:$0xff]  ;;  %v477_v49 = vld [vmem:[%s2896_s7 + $0x7d0] sm:$0xff] }
  0xd0   : > { %v1539_v0 = vmax.f32 %v1538_v51, %v473_v44  ;;  %v993_v1 = vmin.f32 %v992_v48, %v471_v30  ;;  %v1629_v3 = vmax.f32 %v1628_v53, %v561_v58  ;;  %v1554_v11 = vmax.f32 %v1553_v59, %v487_v4  ;;  %v489_v30 = vld [vmem:[%s2896_s7 + $0x830] sm:$0xff]  ;;  %v2566_v37 = vld [vmem:[%s2896_s7 + $0xc00] sm:$0xff] }
  0xd1   : > { %v1398_v6 = vmax.f32 %v1397_v56, %v334_v2  ;;  %v853_v9 = vmin.f32 %v852_v57, %v333_v52  ;;  %v1082_v7 = vmin.f32 %v1081_v60, %v3143_v19  ;;  %810 = vmin.xlane.f32.xlu0 %v809_v61  ;;  %v1007_v16 = vmin.f32 %v483_v62, %v484_v63  ;;  %v565_v48 = vld [vmem:[%s2896_s7 + $0xa90] sm:$0xff]  ;;  %v338_v56 = vld [vmem:[%s2896_s7 + $0x378] sm:$0xff]  ;;  %v491_v60 = vld [vmem:[%s2896_s7 + $0x840] sm:$0xff] }
  0xd2   : > { %v1540_v8 = vmax.f32 %v1539_v0, %v474_v5  ;;  %v994_v12 = vmin.f32 %v993_v1, %v472_v43  ;;  %v1630_v14 = vmax.f32 %v1629_v3, %v3178_v10  ;;  %v1555_v19 = vmax.f32 %v1554_v11, %v488_v15  ;;  %v337_v43 = vld [vmem:[%s2896_s7 + $0x370] sm:$0xff]  ;;  %v478_v63 = vld [vmem:[%s2896_s7 + $0x7d8] sm:$0xff]  ;;  %v339_v3 = vld [vmem:[%s2896_s7 + $0x380] sm:$0xff] }
  0xd3   : > { %v1399_v18 = vmax.f32 %v1398_v6, %v335_v13  ;;  %v854_v21 = vmin.f32 %v853_v9, %v334_v2  ;;  %v1083_v20 = vmin.f32 %v1082_v7, %v559_v33  ;;  %v1008_v31 = vmin.f32 %v1007_v16, %v485_v54  ;;  %v566_v61 = vld [vmem:[%s2896_s7 + $0xa98] sm:$0xff]  ;;  %v3203_v6 = vld [vmem:[%s2896_s7 + $0x848] sm:$0xff] }
  0xd4   : > { %v1541_v24 = vmax.f32 %v1540_v8, %v475_v17  ;;  %v995_v25 = vmin.f32 %v994_v12, %v473_v44  ;;  %v1631_v27 = vmax.f32 %v1630_v14, %v563_v22  ;;  %v1556_v40 = vmax.f32 %v1555_v19, %v489_v30  ;;  %v567_v8 = vld [vmem:[%s2896_s7 + $0xaa0] sm:$0xff]  ;;  %v340_v16 = vld [vmem:[%s2896_s7 + $0x388] sm:$0xff] }
  0xd5   : > { %v1400_v36 = vmax.f32 %v1399_v18, %v336_v26  ;;  %v855_v34 = vmin.f32 %v854_v21, %v335_v13  ;;  %v1084_v39 = vmin.f32 %v1083_v20, %v3161_v47  ;;  %v1009_v46 = vmin.f32 %v1008_v31, %v3167_v55  ;;  %v493_v18 = vld [vmem:[%s2896_s7 + $0x850] sm:$0xff]  ;;  %v480_v20 = vld [vmem:[%s2896_s7 + $0x7e8] sm:$0xff] }
  0xd6   : > { %v1542_v33 = vmax.f32 %v1541_v24, %v476_v32  ;;  %v996_v41 = vmin.f32 %v995_v25, %v474_v5  ;;  %v1632_v44 = vmax.f32 %v1631_v27, %v564_v38  ;;  %v1557_v53 = vmax.f32 %v1556_v40, %v490_v45  ;;  %v3212_v24 = vld [vmem:[%s2896_s7 + $0xaa8] sm:$0xff]  ;;  %v341_v31 = vld [vmem:[%s2896_s7 + $0x390] sm:$0xff] }
  0xd7   : > { %v1401_v50 = vmax.f32 %v1400_v36, %v337_v43  ;;  %v856_v51 = vmin.f32 %v855_v34, %v336_v26  ;;  %v1085_v52 = vmin.f32 %v1084_v39, %v561_v58  ;;  %v1010_v62 = vmin.f32 %v1009_v46, %v487_v4  ;;  %v479_v4 = vld [vmem:[%s2896_s7 + $0x7e0] sm:$0xff]  ;;  %v3217_v36 = vld [vmem:[%s2896_s7 + $0x858] sm:$0xff] }
  0xd8   : > { %v1543_v47 = vmax.f32 %v1542_v33, %v477_v49  ;;  %v997_v54 = vmin.f32 %v996_v41, %v475_v17  ;;  %v1633_v57 = vmax.f32 %v1632_v44, %v565_v48  ;;  %v1558_v1 = vmax.f32 %v1557_v53, %v491_v60  ;;  %v569_v33 = vld [vmem:[%s2896_s7 + $0xab0] sm:$0xff]  ;;  %v342_v46 = vld [vmem:[%s2896_s7 + $0x398] sm:$0xff] }
  0xd9   : > { %v1402_v59 = vmax.f32 %v1401_v50, %v338_v56  ;;  %v857_v55 = vmin.f32 %v856_v51, %v337_v43  ;;  %v1086_v0 = vmin.f32 %v1085_v52, %v3178_v10  ;;  %v1011_v9 = vmin.f32 %v1010_v62, %v488_v15  ;;  %v495_v50 = vld [vmem:[%s2896_s7 + $0x860] sm:$0xff]  ;;  %v3227_v52 = vld [vmem:[%s2896_s7 + $0x7f8] sm:$0xff] }
  0xda   : > { %v1544_v58 = vmax.f32 %v1543_v47, %v478_v63  ;;  %v998_v2 = vmin.f32 %v997_v54, %v476_v32  ;;  %v1634_v5 = vmax.f32 %v1633_v57, %v566_v61  ;;  %v1559_v10 = vmax.f32 %v1558_v1, %v3203_v6  ;;  %v3230_v47 = vld [vmem:[%s2896_s7 + $0xab8] sm:$0xff]  ;;  %v343_v62 = vld [vmem:[%s2896_s7 + $0x3a0] sm:$0xff] }
  0xdb   : > { %v1403_v7 = vmax.f32 %v1402_v59, %v339_v3  ;;  %v858_v11 = vmin.f32 %v857_v55, %v338_v56  ;;  %v1087_v12 = vmin.f32 %v1086_v0, %v563_v22  ;;  %v1012_v21 = vmin.f32 %v1011_v9, %v489_v30  ;;  %v481_v30 = vld [vmem:[%s2896_s7 + $0x7f0] sm:$0xff]  ;;  %v571_v1 = vld [vmem:[%s2896_s7 + $0xac0] sm:$0xff]  ;;  %v344_v9 = vld [vmem:[%s2896_s7 + $0x3a8] sm:$0xff] }
  0xdc   : > { %v1545_v13 = vmax.f32 %v1544_v58, %v479_v4  ;;  %v999_v14 = vmin.f32 %v998_v2, %v477_v49  ;;  %v1635_v17 = vmax.f32 %v1634_v5, %v567_v8  ;;  %v1560_v22 = vmax.f32 %v1559_v10, %v493_v18  ;;  %v677_v2 = vld [vmem:[%s2896_s7 + $0xe10] sm:$0xff] }
  0xdd   : > { %v1404_v15 = vmax.f32 %v1403_v7, %v340_v16  ;;  %v859_v19 = vmin.f32 %v858_v11, %v339_v3  ;;  %v1088_v25 = vmin.f32 %v1087_v12, %v564_v38  ;;  %v1013_v34 = vmin.f32 %v1012_v21, %v490_v45  ;;  %v3244_v3 = vld [vmem:[%s2896_s7 + $0xe18] sm:$0xff]  ;;  %v3248_v7 = vld [vmem:[%s2896_s7 + $0xac8] sm:$0xff]  ;;  %v679_v21 = vld [vmem:[%s2896_s7 + $0xe20] sm:$0xff] }
  0xde   : > { %v1546_v26 = vmax.f32 %v1545_v13, %v480_v20  ;;  %v1000_v27 = vmin.f32 %v999_v14, %v478_v63  ;;  %v1636_v32 = vmax.f32 %v1635_v17, %v3212_v24  ;;  %v1561_v38 = vmax.f32 %v1560_v22, %v3217_v36  ;;  %v3237_v63 = vld [vmem:[%s2896_s7 + $0x868] sm:$0xff] }
  0xdf   : > { %v1405_v39 = vmax.f32 %v1404_v15, %v341_v31  ;;  %v860_v40 = vmin.f32 %v859_v19, %v340_v16  ;;  %v1089_v41 = vmin.f32 %v1088_v25, %v565_v48  ;;  %v1014_v51 = vmin.f32 %v1013_v34, %v491_v60  ;;  %v675_v16 = vld [vmem:[%s2896_s7 + $0xe00] sm:$0xff]  ;;  %v676_v17 = vld [vmem:[%s2896_s7 + $0xe08] sm:$0xff]  ;;  %v345_v15 = vld [vmem:[%s2896_s7 + $0x3b0] sm:$0xff] }
  0xe0   : > { %v3222_v43 = vmax.f32 %v1546_v26, %v481_v30  ;;  %v1001_v44 = vmin.f32 %v1000_v27, %v479_v4  ;;  %v1637_v49 = vmax.f32 %v1636_v32, %v569_v33  ;;  %v1562_v54 = vmax.f32 %v1561_v38, %v495_v50  ;;  %v3263_v34 = vld [vmem:[%s2896_s7 + $0xe28] sm:$0xff] }
  0xe1   : > { %v1406_v45 = vmax.f32 %v1405_v39, %v342_v46  ;;  %v861_v53 = vmin.f32 %v860_v40, %v341_v31  ;;  %v1090_v48 = vmin.f32 %v1089_v41, %v566_v61  ;;  %v1015_v59 = vmin.f32 %v1014_v51, %v3203_v6  ;;  %v497_v6 = vld [vmem:[%s2896_s7 + $0x870] sm:$0xff]  ;;  %v499_v40 = vld [vmem:[%s2896_s7 + $0x880] sm:$0xff] }
  0xe2   : > { %v1548_v56 = vmax.f32 %v3222_v43, %v3227_v52  ;;  %v1002_v57 = vmin.f32 %v1001_v44, %v480_v20  ;;  %v1638_v60 = vmax.f32 %v1637_v49, %v3230_v47  ;;  %v1563_v58 = vmax.f32 %v1562_v54, %v3237_v63  ;;  %v574_v49 = vld [vmem:[%s2896_s7 + $0xad8] sm:$0xff]  ;;  %v500_v54 = vld [vmem:[%s2896_s7 + $0x888] sm:$0xff] }
  0xe3   : > { %v1407_v55 = vmax.f32 %v1406_v45, %v343_v62  ;;  %v862_v0 = vmin.f32 %v861_v53, %v342_v46  ;;  %v1091_v61 = vmin.f32 %v1090_v48, %v567_v8  ;;  %v1016_v11 = vmin.f32 %v1015_v59, %v493_v18  ;;  %v498_v18 = vld [vmem:[%s2896_s7 + $0x878] sm:$0xff]  ;;  %v681_v45 = vld [vmem:[%s2896_s7 + $0xe30] sm:$0xff]  ;;  %v347_v53 = vld [vmem:[%s2896_s7 + $0x3c0] sm:$0xff] }
  0xe4   : > { %v1003_v5 = vmin.f32 %v1002_v57, %v481_v30  ;;  %v1639_v4 = vmax.f32 %v1638_v60, %v571_v1  ;;  %v1748_v12 = vmax.f32 %v3244_v3, %v677_v2  ;;  %v1564_v14 = vmax.f32 %v1563_v58, %v497_v6  ;;  %v346_v30 = vld [vmem:[%s2896_s7 + $0x3b8] sm:$0xff]  ;;  %v348_v58 = vld [vmem:[%s2896_s7 + $0x3c8] sm:$0xff] }
  0xe5   : > { %v1408_v8 = vmax.f32 %v1407_v55, %v344_v9  ;;  %v863_v10 = vmin.f32 %v862_v0, %v343_v62  ;;  %v1092_v13 = vmin.f32 %v1091_v61, %v3212_v24  ;;  %v1017_v25 = vmin.f32 %v1016_v11, %v3217_v36  ;;  %v573_v24 = vld [vmem:[%s2896_s7 + $0xad0] sm:$0xff]  ;;  %v575_v55 = vld [vmem:[%s2896_s7 + $0xae0] sm:$0xff]  ;;  %v2559_v43 = vld [vmem:[%s2896_s7 + $0xe08] sm:$0xff] }
  0xe6   : > { %v1004_v20 = vmin.f32 %v1003_v5, %v3227_v52  ;;  %v1640_v19 = vmax.f32 %v1639_v4, %v3248_v7  ;;  %v1749_v22 = vmax.f32 %v1748_v12, %v679_v21  ;;  %v1565_v32 = vmax.f32 %v1564_v14, %v498_v18  ;;  %v349_v14 = vld [vmem:[%s2896_s7 + $0x3d0] sm:$0xff] }
  0xe7   : > { %v1409_v26 = vmax.f32 %v1408_v8, %v345_v15  ;;  %v864_v27 = vmin.f32 %v863_v10, %v344_v9  ;;  %v1093_v31 = vmin.f32 %v1092_v13, %v569_v33  ;;  %v1018_v41 = vmin.f32 %v1017_v25, %v495_v50  ;;  %v501_v9 = vld [vmem:[%s2896_s7 + $0x890] sm:$0xff]  ;;  %v576_v8 = vld [vmem:[%s2896_s7 + $0xae8] sm:$0xff]  ;;  %v683_v13 = vld [vmem:[%s2896_s7 + $0xe40] sm:$0xff] }
  0xe8   : > { %1005 = vmin.xlane.f32.xlu1 %v1004_v20  ;;  %v1641_v39 = vmax.f32 %v1640_v19, %v573_v24  ;;  %v1750_v38 = vmax.f32 %v1749_v22, %v3263_v34  ;;  %v1202_v36 = vmin.f32 %v675_v16, %v676_v17  ;;  %v1566_v51 = vmax.f32 %v1565_v32, %v499_v40  ;;  %v3287_v17 = vld [vmem:[%s2896_s7 + $0x898] sm:$0xff]  ;;  %v577_v25 = vld [vmem:[%s2896_s7 + $0xaf0] sm:$0xff]  ;;  %v503_v32 = vld [vmem:[%s2896_s7 + $0x8a0] sm:$0xff] }
  0xe9   : > { %v1410_v44 = vmax.f32 %v1409_v26, %v346_v30  ;;  %v865_v46 = vmin.f32 %v864_v27, %v345_v15  ;;  %v1094_v33 = vmin.f32 %v1093_v31, %v3230_v47  ;;  %v1019_v57 = vmin.f32 %v1018_v41, %v3237_v63  ;;  %v3276_v47 = vld [vmem:[%s2896_s7 + $0xe38] sm:$0xff] }
  0xea   : > { %v1642_v48 = vmax.f32 %v1641_v39, %v574_v49  ;;  %v1751_v50 = vmax.f32 %v1750_v38, %v681_v45  ;;  %v1203_v62 = vmin.f32 %v1202_v36, %v677_v2  ;;  %v1567_v61 = vmax.f32 %v1566_v51, %v500_v54  ;;  %v350_v27 = vld [vmem:[%s2896_s7 + $0x3d8] sm:$0xff]  ;;  %v3305_v51 = vld [vmem:[%s2896_s7 + $0x8a8] sm:$0xff] }
  0xeb   : > { %v1411_v60 = vmax.f32 %v1410_v44, %v347_v53  ;;  %v866_v59 = vmin.f32 %v865_v46, %v346_v30  ;;  %v1095_v0 = vmin.f32 %v1094_v33, %v571_v1  ;;  %v1020_v4 = vmin.f32 %v1019_v57, %v497_v6  ;;  %v3299_v38 = vld [vmem:[%s2896_s7 + $0xaf8] sm:$0xff]  ;;  %v685_v44 = vld [vmem:[%s2896_s7 + $0xe50] sm:$0xff]  ;;  %v351_v46 = vld [vmem:[%s2896_s7 + $0x3e0] sm:$0xff] }
  0xec   : > { %v1643_v5 = vmax.f32 %v1642_v48, %v575_v55  ;;  %v1752_v11 = vmax.f32 %v1751_v50, %v3276_v47  ;;  %v1204_v63 = vmin.f32 %v1203_v62, %v3244_v3  ;;  %v1568_v10 = vmax.f32 %v1567_v61, %v501_v9  ;;  %v579_v50 = vld [vmem:[%s2896_s7 + $0xb00] sm:$0xff]  ;;  %v505_v61 = vld [vmem:[%s2896_s7 + $0x8b0] sm:$0xff] }
  0xed   : > { %v1412_v2 = vmax.f32 %v1411_v60, %v348_v58  ;;  %v867_v12 = vmin.f32 %v866_v59, %v347_v53  ;;  %v1096_v1 = vmin.f32 %v1095_v0, %v3248_v7  ;;  %v1021_v6 = vmin.f32 %v1020_v4, %v498_v18  ;;  %v3292_v7 = vld [vmem:[%s2896_s7 + $0xe48] sm:$0xff]  ;;  %v3310_v60 = vld [vmem:[%s2896_s7 + $0xe58] sm:$0xff] }
  0xee   : > { %v1644_v16 = vmax.f32 %v1643_v5, %v576_v8  ;;  %v1753_v20 = vmax.f32 %v1752_v11, %v683_v13  ;;  %v1205_v15 = vmin.f32 %v1204_v63, %v679_v21  ;;  %v1569_v26 = vmax.f32 %v1568_v10, %v3287_v17  ;;  %v352_v59 = vld [vmem:[%s2896_s7 + $0x3e8] sm:$0xff]  ;;  %v3320_v10 = vld [vmem:[%s2896_s7 + $0x8b8] sm:$0xff] }
  0xef   : > { %v1413_v19 = vmax.f32 %v1412_v2, %v349_v14  ;;  %v868_v3 = vmin.f32 %v867_v12, %v348_v58  ;;  %v1097_v22 = vmin.f32 %v1096_v1, %v573_v24  ;;  %v1022_v30 = vmin.f32 %v1021_v6, %v499_v40  ;;  %v580_v11 = vld [vmem:[%s2896_s7 + $0xb08] sm:$0xff]  ;;  %v687_v2 = vld [vmem:[%s2896_s7 + $0xe60] sm:$0xff]  ;;  %v353_v12 = vld [vmem:[%s2896_s7 + $0x3f0] sm:$0xff] }
  0xf0   : > { %v1645_v31 = vmax.f32 %v1644_v16, %v577_v25  ;;  %v1754_v18 = vmax.f32 %v1753_v20, %v3292_v7  ;;  %v1206_v21 = vmin.f32 %v1205_v15, %v3263_v34  ;;  %v1570_v36 = vmax.f32 %v1569_v26, %v503_v32  ;;  %v581_v20 = vld [vmem:[%s2896_s7 + $0xb10] sm:$0xff]  ;;  %v3334_v26 = vld [vmem:[%s2896_s7 + $0xb18] sm:$0xff] }
  0xf1   : > { %v1414_v39 = vmax.f32 %v1413_v19, %v350_v27  ;;  %v869_v41 = vmin.f32 %v868_v3, %v349_v14  ;;  %v1098_v24 = vmin.f32 %v1097_v22, %v574_v49  ;;  %v1023_v40 = vmin.f32 %v1022_v30, %v500_v54  ;;  %v3328_v19 = vld [vmem:[%s2896_s7 + $0xe68] sm:$0xff]  ;;  %v3331_v3 = vld [vmem:[%s2896_s7 + $0x3f8] sm:$0xff] }
  0xf2   : > { %v1646_v33 = vmax.f32 %v1645_v31, %v3299_v38  ;;  %v1755_v53 = vmax.f32 %v1754_v18, %v685_v44  ;;  %v1207_v48 = vmin.f32 %v1206_v21, %v681_v45  ;;  %v1571_v49 = vmax.f32 %v1570_v36, %v3305_v51 }
  0xf3   : > { %v1415_v34 = vmax.f32 %v1414_v39, %v351_v46  ;;  %v870_v57 = vmin.f32 %v869_v41, %v350_v27  ;;  %v1099_v62 = vmin.f32 %v1098_v24, %v575_v55  ;;  %v1024_v58 = vmin.f32 %v1023_v40, %v501_v9  ;;  %v3343_v39 = vld [vmem:[%s2896_s7 + $0x8c8] sm:$0xff]  ;;  %v689_v41 = vld [vmem:[%s2896_s7 + $0xe70] sm:$0xff]  ;;  %v611_v24 = vld [vmem:[%s2896_s7 + $0xc00] sm:$0xff] }
  0xf4   : > { %v1647_v0 = vmax.f32 %v1646_v33, %v579_v50  ;;  %v1756_v54 = vmax.f32 %v1755_v53, %v3310_v60  ;;  %v1208_v45 = vmin.f32 %v1207_v48, %v3276_v47  ;;  %v1572_v63 = vmax.f32 %v1571_v49, %v505_v61  ;;  %v612_v33 = vld [vmem:[%s2896_s7 + $0xc08] sm:$0xff]  ;;  %v613_v40 = vld [vmem:[%s2896_s7 + $0xc10] sm:$0xff]  ;;  %v614_v53 = vld [vmem:[%s2896_s7 + $0xc18] sm:$0xff] }
  0xf5   : > { %v1416_v5 = vmax.f32 %v1415_v34, %v352_v59  ;;  %v871_v4 = vmin.f32 %v870_v57, %v351_v46  ;;  %v1100_v55 = vmin.f32 %v1099_v62, %v576_v8  ;;  %v1025_v9 = vmin.f32 %v1024_v58, %v3287_v17  ;;  %v507_v17 = vld [vmem:[%s2896_s7 + $0x8c0] sm:$0xff]  ;;  %v3356_v62 = vld [vmem:[%s2896_s7 + $0xe78] sm:$0xff] }
  0xf6   : > { %v1648_v1 = vmax.f32 %v1647_v0, %v580_v11  ;;  %v1757_v14 = vmax.f32 %v1756_v54, %v687_v2  ;;  %v1209_v16 = vmin.f32 %v1208_v45, %v683_v13  ;;  %v1573_v8 = vmax.f32 %v1572_v63, %v3320_v10  ;;  %v583_v48 = vld [vmem:[%s2896_s7 + $0xb20] sm:$0xff]  ;;  %v510_v63 = vld [vmem:[%s2896_s7 + $0x8d8] sm:$0xff] }
  0xf7   : > { %v3323_v6 = vmax.f32 %v1416_v5, %v353_v12  ;;  %v872_v47 = vmin.f32 %v871_v4, %v352_v59  ;;  %v1101_v15 = vmin.f32 %v1100_v55, %v577_v25  ;;  %v1026_v13 = vmin.f32 %v1025_v9, %v503_v32  ;;  %v615_v54 = vld [vmem:[%s2896_s7 + $0xc20] sm:$0xff] }
  0xf8   : > { %v1649_v22 = vmax.f32 %v1648_v1, %v581_v20  ;;  %v1758_v27 = vmax.f32 %v1757_v14, %v3328_v19  ;;  %v1210_v31 = vmin.f32 %v1209_v16, %v3292_v7  ;;  %v1574_v21 = vmax.f32 %v1573_v8, %v507_v17  ;;  %v691_v5 = vld [vmem:[%s2896_s7 + $0xe80] sm:$0xff]  ;;  %v584_v14 = vld [vmem:[%s2896_s7 + $0xb28] sm:$0xff] }
  0xf9   : > { %v1418_v25 = vmax.f32 %v3323_v6, %v3331_v3  ;;  %v873_v30 = vmin.f32 %v872_v47, %v353_v12  ;;  %v1102_v18 = vmin.f32 %v1101_v15, %v3299_v38  ;;  %v1027_v36 = vmin.f32 %v1026_v13, %v3305_v51  ;;  %v509_v51 = vld [vmem:[%s2896_s7 + $0x8d0] sm:$0xff]  ;;  %v3368_v47 = vld [vmem:[%s2896_s7 + $0xe88] sm:$0xff] }
  0xfa   : > { %v1650_v32 = vmax.f32 %v1649_v22, %v3334_v26  ;;  %v1759_v46 = vmax.f32 %v1758_v27, %v689_v41  ;;  %v1211_v7 = vmin.f32 %v1210_v31, %v685_v44  ;;  %v1575_v57 = vmax.f32 %v1574_v21, %v3343_v39  ;;  %v511_v22 = vld [vmem:[%s2896_s7 + $0x8e0] sm:$0xff] }
  0xfb   : > { %v874_v38 = vmin.f32 %v873_v30, %v3331_v3  ;;  %v1103_v34 = vmin.f32 %v1102_v18, %v579_v50  ;;  %v1683_v49 = vmax.f32 %v614_v53, %v613_v40  ;;  %v1028_v0 = vmin.f32 %v1027_v36, %v505_v61  ;;  %v616_v61 = vld [vmem:[%s2896_s7 + $0xc28] sm:$0xff]  ;;  %v693_v30 = vld [vmem:[%s2896_s7 + $0xe90] sm:$0xff]  ;;  %v2556_v3 = vld [vmem:[%s2896_s7 + $0xa00] sm:$0xff] }
  0xfc   : > { %v1651_v59 = vmax.f32 %v1650_v32, %v583_v48  ;;  %v1760_v44 = vmax.f32 %v1759_v46, %v3356_v62  ;;  %v1212_v58 = vmin.f32 %v1211_v7, %v3310_v60  ;;  %v1576_v50 = vmax.f32 %v1575_v57, %v509_v51  ;;  %v585_v7 = vld [vmem:[%s2896_s7 + $0xb30] sm:$0xff] }
  0xfd   : > { %875 = vmin.xlane.f32.xlu0 %v874_v38  ;;  %v1104_v45 = vmin.f32 %v1103_v34, %v580_v11  ;;  %v1684_v4 = vmax.f32 %v1683_v49, %v615_v54  ;;  %v1137_v55 = vmin.f32 %v611_v24, %v612_v33  ;;  %v1029_v12 = vmin.f32 %v1028_v0, %v3320_v10  ;;  %v617_v10 = vld [vmem:[%s2896_s7 + $0xc30] sm:$0xff]  ;;  %v512_v24 = vld [vmem:[%s2896_s7 + $0x8e8] sm:$0xff] }
  0xfe   : > { %v1761_v1 = vmax.f32 %v1760_v44, %v691_v5  ;;  %v1213_v9 = vmin.f32 %v1212_v58, %v687_v2  ;;  %v1577_v60 = vmax.f32 %v1576_v50, %v510_v63  ;;  %v1652_v8 = vmax.f32 %v1651_v59, %v584_v14  ;;  %v514_v50 = vld [vmem:[%s2896_s7 + $0x8f8] sm:$0xff] }
  0xff   : > { %v1105_v16 = vmin.f32 %v1104_v45, %v581_v20  ;;  %v1685_v11 = vmax.f32 %v1684_v4, %v616_v61  ;;  %v1138_v15 = vmin.f32 %v1137_v55, %v613_v40  ;;  %v1030_v13 = vmin.f32 %v1029_v12, %v507_v17  ;;  %v618_v17 = vld [vmem:[%s2896_s7 + $0xc38] sm:$0xff] }
 0x100   : > { %v1762_v27 = vmax.f32 %v1761_v1, %v3368_v47  ;;  %v1214_v2 = vmin.f32 %v1213_v9, %v3328_v19  ;;  %v1578_v20 = vmax.f32 %v1577_v60, %v511_v22  ;;  %v3381_v40 = vld [vmem:[%s2896_s7 + $0xe98] sm:$0xff]  ;;  %v1653_v34 = vmax.f32 %v1652_v8, %v585_v7  ;;  %v587_v60 = vld [vmem:[%s2896_s7 + $0xb40] sm:$0xff] }
 0x101   : > { %v1106_v31 = vmin.f32 %v1105_v16, %v3334_v26  ;;  %v1686_v18 = vmax.f32 %v1685_v11, %v617_v10  ;;  %v1139_v21 = vmin.f32 %v1138_v15, %v614_v53  ;;  %v1031_v32 = vmin.f32 %v1030_v13, %v3343_v39  ;;  %v513_v53 = vld [vmem:[%s2896_s7 + $0x8f0] sm:$0xff]  ;;  %v586_v45 = vld [vmem:[%s2896_s7 + $0xb38] sm:$0xff] }
 0x102   : > { %v1763_v36 = vmax.f32 %v1762_v27, %v693_v30  ;;  %v1215_v46 = vmin.f32 %v1214_v2, %v689_v41  ;;  %v1579_v19 = vmax.f32 %v1578_v20, %v512_v24  ;;  %v619_v41 = vld [vmem:[%s2896_s7 + $0xc40] sm:$0xff]  ;;  %v1654_v16 = vmax.f32 %v1653_v34, %v586_v45  ;;  %v697_v27 = vld [vmem:[%s2896_s7 + $0xeb0] sm:$0xff]  ;;  %v588_v20 = vld [vmem:[%s2896_s7 + $0xb48] sm:$0xff] }
 0x103   : > { %v1107_v33 = vmin.f32 %v1106_v31, %v583_v48  ;;  %v1687_v26 = vmax.f32 %v1686_v18, %v618_v17  ;;  %v1140_v38 = vmin.f32 %v1139_v21, %v615_v54  ;;  %v1032_v57 = vmin.f32 %v1031_v32, %v509_v51  ;;  %v695_v48 = vld [vmem:[%s2896_s7 + $0xea0] sm:$0xff]  ;;  %v620_v51 = vld [vmem:[%s2896_s7 + $0xc48] sm:$0xff] }
 0x104   : > { %v1764_v49 = vmax.f32 %v1763_v36, %v3381_v40  ;;  %v1216_v39 = vmin.f32 %v1215_v46, %v3356_v62  ;;  %v1580_v0 = vmax.f32 %v1579_v19, %v513_v53  ;;  %v3392_v62 = vld [vmem:[%s2896_s7 + $0xea8] sm:$0xff]  ;;  %v1655_v19 = vmax.f32 %v1654_v16, %v587_v60 }
 0x105   : > { %v1108_v59 = vmin.f32 %v1107_v33, %v584_v14  ;;  %v1688_v44 = vmax.f32 %v1687_v26, %v619_v41  ;;  %v1141_v58 = vmin.f32 %v1140_v38, %v616_v61  ;;  %v1033_v54 = vmin.f32 %v1032_v57, %v510_v63  ;;  %v515_v61 = vld [vmem:[%s2896_s7 + $0x900] sm:$0xff]  ;;  %v621_v63 = vld [vmem:[%s2896_s7 + $0xc50] sm:$0xff] }
 0x106   : > { %v1765_v4 = vmax.f32 %v1764_v49, %v695_v48  ;;  %v1217_v55 = vmin.f32 %v1216_v39, %v691_v5  ;;  %v1581_v1 = vmax.f32 %v1580_v0, %v514_v50  ;;  %v589_v26 = vld [vmem:[%s2896_s7 + $0xb50] sm:$0xff]  ;;  %v623_v57 = vld [vmem:[%s2896_s7 + $0xc60] sm:$0xff]  ;;  %v2780_v23 = vmov -inf  }
 0x107   : > { %v1109_v12 = vmin.f32 %v1108_v59, %v585_v7  ;;  %v1689_v9 = vmax.f32 %v1688_v44, %v620_v51  ;;  %v1142_v14 = vmin.f32 %v1141_v58, %v617_v10  ;;  %v1034_v11 = vmin.f32 %v1033_v54, %v511_v22  ;;  %v516_v10 = vld [vmem:[%s2896_s7 + $0x908] sm:$0xff]  ;;  %v622_v22 = vld [vmem:[%s2896_s7 + $0xc58] sm:$0xff]  ;;  %v517_v38 = vld [vmem:[%s2896_s7 + $0x910] sm:$0xff]  ;;  %220 = vst.msk [vmem:[%s3786_s28 + $0x8] sm:$0xff] %vm210_vm0, %v2780_v23 }
 0x108   : > { %v1766_v15 = vmax.f32 %v1765_v4, %v3392_v62  ;;  %v1218_v5 = vmin.f32 %v1217_v55, %v3368_v47  ;;  %v1582_v13 = vmax.f32 %v1581_v1, %v515_v61  ;;  %v698_v47 = vld [vmem:[%s2896_s7 + $0xeb8] sm:$0xff]  ;;  %v699_v39 = vld [vmem:[%s2896_s7 + $0xec0] sm:$0xff]  ;;  %v700_v55 = vld [vmem:[%s2896_s7 + $0xec8] sm:$0xff]  ;;  %219 = vst.msk [vmem:[%s3786_s28] sm:$0xff] %vm210_vm0, %v2780_v23 }
 0x109   : > { %v1110_v8 = vmin.f32 %v1109_v12, %v586_v45  ;;  %v1690_v2 = vmax.f32 %v1689_v9, %v621_v63  ;;  %v1143_v31 = vmin.f32 %v1142_v14, %v618_v17  ;;  %v1035_v18 = vmin.f32 %v1034_v11, %v512_v24  ;;  %v3410_v44 = vld [vmem:[%s2896_s7 + $0xb58] sm:$0xff]  ;;  %v3416_v9 = vld [vmem:[%s2896_s7 + $0xb60] sm:$0xff]  ;;  %v701_v11 = vld [vmem:[%s2896_s7 + $0xed0] sm:$0xff]  ;;  %221 = vst.msk [vmem:[%s3786_s28 + $0x10] sm:$0xff] %vm210_vm0, %v2780_v23 }
 0x10a   : > { %v1767_v21 = vmax.f32 %v1766_v15, %v697_v27  ;;  %v1219_v32 = vmin.f32 %v1218_v5, %v693_v30  ;;  %v1583_v46 = vmax.f32 %v1582_v13, %v516_v10  ;;  %222 = vst.msk [vmem:[%s3786_s28 + $0x18] sm:$0xff] %vm210_vm0, %v2780_v23  ;;  %223 = vst.msk [vmem:[%s3786_s28 + $0x20] sm:$0xff] %vm210_vm0, %v2780_v23 }
 0x10b   : > { %v1111_v36 = vmin.f32 %v1110_v8, %v587_v60  ;;  %v1691_v7 = vmax.f32 %v1690_v2, %v622_v22  ;;  %v1144_v33 = vmin.f32 %v1143_v31, %v619_v41  ;;  %v1036_v17 = vmin.f32 %v1035_v18, %v513_v53  ;;  %v518_v41 = vld [vmem:[%s2896_s7 + $0x918] sm:$0xff]  ;;  %v624_v53 = vld [vmem:[%s2896_s7 + $0xc68] sm:$0xff]  ;;  %224 = vst.msk [vmem:[%s3786_s28 + $0x28] sm:$0xff] %vm210_vm0, %v2780_v23 }
 0x10c   : > { %v1768_v34 = vmax.f32 %v1767_v21, %v698_v47  ;;  %v1220_v24 = vmin.f32 %v1219_v32, %v3381_v40  ;;  %v1584_v49 = vmax.f32 %v1583_v46, %v517_v38  ;;  %v1656_v60 = vmax.f32 %v1655_v19, %v588_v20  ;;  %v3423_v8 = vld [vmem:[%s2896_s7 + $0xb68] sm:$0xff]  ;;  %v626_v31 = vld [vmem:[%s2896_s7 + $0xc78] sm:$0xff]  ;;  %v703_v19 = vld [vmem:[%s2896_s7 + $0xee0] sm:$0xff]  ;;  %225 = vst.msk [vmem:[%s3786_s28 + $0x30] sm:$0xff] %vm210_vm0, %v2780_v23 }
 0x10d   : > { %v1112_v30 = vmin.f32 %v1111_v36, %v588_v20  ;;  %v1692_v59 = vmax.f32 %v1691_v7, %v623_v57  ;;  %v1145_v0 = vmin.f32 %v1144_v33, %v620_v51  ;;  %v1037_v58 = vmin.f32 %v1036_v17, %v514_v50  ;;  %v625_v50 = vld [vmem:[%s2896_s7 + $0xc70] sm:$0xff]  ;;  %v702_v18 = vld [vmem:[%s2896_s7 + $0xed8] sm:$0xff]  ;;  %226 = vst.msk [vmem:[%s3786_s28 + $0x38] sm:$0xff] %vm210_vm0, %v2780_v23 }
 0x10e   : > { %v1769_v45 = vmax.f32 %v1768_v34, %v699_v39  ;;  %v1221_v54 = vmin.f32 %v1220_v24, %v695_v48  ;;  %v1585_v40 = vmax.f32 %v1584_v49, %v518_v41  ;;  %v3430_v36 = vld [vmem:[%s2896_s7 + $0xb70] sm:$0xff]  ;;  %v1657_v33 = vmax.f32 %v1656_v60, %v589_v26  ;;  %v3436_v24 = vld [vmem:[%s2896_s7 + $0xb78] sm:$0xff] }
 0x10f   : > { %v1113_v4 = vmin.f32 %v1112_v30, %v589_v26  ;;  %v1693_v12 = vmax.f32 %v1692_v59, %v624_v53  ;;  %v1146_v1 = vmin.f32 %v1145_v0, %v621_v63  ;;  %v1038_v51 = vmin.f32 %v1037_v58, %v515_v61  ;;  %v519_v63 = vld [vmem:[%s2896_s7 + $0x920] sm:$0xff]  ;;  %v520_v30 = vld [vmem:[%s2896_s7 + $0x928] sm:$0xff] }
 0x110   : > { %v1770_v14 = vmax.f32 %v1769_v45, %v700_v55  ;;  %v1222_v16 = vmin.f32 %v1221_v54, %v3392_v62  ;;  %v1586_v20 = vmax.f32 %v1585_v40, %v519_v63  ;;  %v628_v59 = vld [vmem:[%s2896_s7 + $0xc88] sm:$0xff]  ;;  %v3443_v54 = vld [vmem:[%s2896_s7 + $0xb80] sm:$0xff] }
 0x111   : > { %v1114_v48 = vmin.f32 %v1113_v4, %v3410_v44  ;;  %v1694_v15 = vmax.f32 %v1693_v12, %v625_v50  ;;  %v1147_v5 = vmin.f32 %v1146_v1, %v622_v22  ;;  %v1039_v13 = vmin.f32 %v1038_v51, %v516_v10  ;;  %v627_v10 = vld [vmem:[%s2896_s7 + $0xc80] sm:$0xff]  ;;  %v704_v0 = vld [vmem:[%s2896_s7 + $0xee8] sm:$0xff]  ;;  %v521_v1 = vld [vmem:[%s2896_s7 + $0x930] sm:$0xff] }
 0x112   : > { %v1771_v2 = vmax.f32 %v1770_v14, %v701_v11  ;;  %v1223_v61 = vmin.f32 %v1222_v16, %v697_v27  ;;  %v1587_v26 = vmax.f32 %v1586_v20, %v520_v30  ;;  %v1658_v12 = vmax.f32 %v1657_v33, %v3410_v44  ;;  %v705_v51 = vld [vmem:[%s2896_s7 + $0xef0] sm:$0xff]  ;;  %v522_v44 = vld [vmem:[%s2896_s7 + $0x938] sm:$0xff] }
 0x113   : > { %v1115_v62 = vmin.f32 %v1114_v48, %v3416_v9  ;;  %v1695_v21 = vmax.f32 %v1694_v15, %v626_v31  ;;  %v1148_v32 = vmin.f32 %v1147_v5, %v623_v57  ;;  %v1040_v22 = vmin.f32 %v1039_v13, %v517_v38  ;;  %v706_v13 = vld [vmem:[%s2896_s7 + $0xef8] sm:$0xff] }
 0x114   : > { %v1772_v46 = vmax.f32 %v1771_v2, %v702_v18  ;;  %v1224_v7 = vmin.f32 %v1223_v61, %v698_v47 }
 0x115   : > { %v1116_v27 = vmin.f32 %v1115_v62, %v3423_v8  ;;  %v1696_v17 = vmax.f32 %v1695_v21, %v627_v10  ;;  %v1149_v34 = vmin.f32 %v1148_v32, %v624_v53  ;;  %v1041_v57 = vmin.f32 %v1040_v22, %v518_v41  ;;  %v629_v41 = vld [vmem:[%s2896_s7 + $0xc90] sm:$0xff]  ;;  %v631_v32 = vld [vmem:[%s2896_s7 + $0xca0] sm:$0xff] }
 0x116   : > { %v1773_v49 = vmax.f32 %v1772_v46, %v703_v19  ;;  %v1225_v38 = vmin.f32 %v1224_v7, %v699_v39  ;;  %v3458_v62 = vld [vmem:[%s2896_s7 + $0xb90] sm:$0xff]  ;;  %v523_v46 = vld [vmem:[%s2896_s7 + $0x940] sm:$0xff] }
 0x117   : > { %v1117_v47 = vmin.f32 %v1116_v27, %v3430_v36  ;;  %v1697_v58 = vmax.f32 %v1696_v17, %v628_v59  ;;  %v1150_v45 = vmin.f32 %v1149_v34, %v625_v50  ;;  %v1042_v53 = vmin.f32 %v1041_v57, %v519_v63  ;;  %v3451_v50 = vld [vmem:[%s2896_s7 + $0xb88] sm:$0xff]  ;;  %v707_v7 = vld [vmem:[%s2896_s7 + $0xf00] sm:$0xff] }
 0x118   : > { %v1774_v4 = vmax.f32 %v1773_v49, %v704_v0  ;;  %v1226_v40 = vmin.f32 %v1225_v38, %v700_v55  ;;  %v630_v55 = vld [vmem:[%s2896_s7 + $0xc98] sm:$0xff]  ;;  %v1588_v63 = vmax.f32 %v1587_v26, %v521_v1  ;;  %v708_v38 = vld [vmem:[%s2896_s7 + $0xf08] sm:$0xff] }
 0x119   : > { %v1118_v39 = vmin.f32 %v1117_v47, %v3436_v24  ;;  %v1698_v14 = vmax.f32 %v1697_v58, %v629_v41  ;;  %v1151_v16 = vmin.f32 %v1150_v45, %v626_v31  ;;  %v1043_v60 = vmin.f32 %v1042_v53, %v520_v30 }
 0x11a   : > { %v1775_v48 = vmax.f32 %v1774_v4, %v705_v51  ;;  %v1227_v15 = vmin.f32 %v1226_v40, %v701_v11  ;;  %v1659_v11 = vmax.f32 %v1658_v12, %v3416_v9  ;;  %v1589_v49 = vmax.f32 %v1588_v63, %v522_v44  ;;  %v3471_v9 = vld [vmem:[%s2896_s7 + $0x948] sm:$0xff]  ;;  %v525_v12 = vld [vmem:[%s2896_s7 + $0x950] sm:$0xff]  ;;  %v710_v63 = vld [vmem:[%s2896_s7 + $0xf18] sm:$0xff] }
 0x11b   : > { %v1119_v5 = vmin.f32 %v1118_v39, %v3443_v54  ;;  %v1699_v2 = vmax.f32 %v1698_v14, %v630_v55  ;;  %v1152_v61 = vmin.f32 %v1151_v16, %v627_v10  ;;  %v1044_v31 = vmin.f32 %v1043_v60, %v521_v1  ;;  %v3466_v10 = vld [vmem:[%s2896_s7 + $0xb98] sm:$0xff]  ;;  %v709_v39 = vld [vmem:[%s2896_s7 + $0xf10] sm:$0xff] }
 0x11c   : > { %v1776_v20 = vmax.f32 %v1775_v48, %v706_v13  ;;  %v1228_v21 = vmin.f32 %v1227_v15, %v702_v18  ;;  %v632_v18 = vld [vmem:[%s2896_s7 + $0xca8] sm:$0xff]  ;;  %v1660_v4 = vmax.f32 %v1659_v11, %v3423_v8  ;;  %v1590_v8 = vmax.f32 %v1589_v49, %v523_v46 }
 0x11d   : > { %v1120_v22 = vmin.f32 %v1119_v5, %v3451_v50  ;;  %v1700_v33 = vmax.f32 %v1699_v2, %v631_v32  ;;  %v1153_v27 = vmin.f32 %v1152_v61, %v628_v59  ;;  %v1045_v17 = vmin.f32 %v1044_v31, %v522_v44  ;;  %v3475_v59 = vld [vmem:[%s2896_s7 + $0xba0] sm:$0xff]  ;;  %v3489_v5 = vld [vmem:[%s2896_s7 + $0x958] sm:$0xff]  ;;  %v3510_v49 = vld [vmem:[%s2896_s7 + $0x968] sm:$0xff] }
 0x11e   : > { %v1777_v34 = vmax.f32 %v1776_v20, %v707_v7  ;;  %v1229_v30 = vmin.f32 %v1228_v21, %v703_v19  ;;  %v633_v19 = vld [vmem:[%s2896_s7 + $0xcb0] sm:$0xff]  ;;  %v1661_v21 = vmax.f32 %v1660_v4, %v3430_v36 }
 0x11f   : > { %v1121_v57 = vmin.f32 %v1120_v22, %v3458_v62  ;;  %v1701_v47 = vmax.f32 %v1700_v33, %v632_v18  ;;  %v1154_v26 = vmin.f32 %v1153_v27, %v629_v41  ;;  %v1046_v58 = vmin.f32 %v1045_v17, %v523_v46  ;;  %v3483_v41 = vld [vmem:[%s2896_s7 + $0xba8] sm:$0xff]  ;;  %v3499_v22 = vld [vmem:[%s2896_s7 + $0x960] sm:$0xff]  ;;  %v637_v4 = vld [vmem:[%s2896_s7 + $0xcd0] sm:$0xff] }
 0x120   : > { %v1778_v45 = vmax.f32 %v1777_v34, %v708_v38  ;;  %v1230_v53 = vmin.f32 %v1229_v30, %v704_v0  ;;  %v634_v0 = vld [vmem:[%s2896_s7 + $0xcb8] sm:$0xff]  ;;  %v711_v46 = vld [vmem:[%s2896_s7 + $0xf20] sm:$0xff]  ;;  %v636_v30 = vld [vmem:[%s2896_s7 + $0xcc8] sm:$0xff] }
 0x121   : > { %v1122_v40 = vmin.f32 %v1121_v57, %v3466_v10  ;;  %v1702_v1 = vmax.f32 %v1701_v47, %v633_v19  ;;  %v1155_v14 = vmin.f32 %v1154_v26, %v630_v55  ;;  %v1047_v16 = vmin.f32 %v1046_v58, %v3471_v9  ;;  %v3493_v55 = vld [vmem:[%s2896_s7 + $0xbb0] sm:$0xff]  ;;  %v712_v47 = vld [vmem:[%s2896_s7 + $0xf28] sm:$0xff]  ;;  %v3514_v58 = vld [vmem:[%s2896_s7 + $0xbc0] sm:$0xff] }
 0x122   : > { %v1779_v60 = vmax.f32 %v1778_v45, %v709_v39  ;;  %v1231_v48 = vmin.f32 %v1230_v53, %v705_v51  ;;  %v635_v51 = vld [vmem:[%s2896_s7 + $0xcc0] sm:$0xff]  ;;  %v1591_v57 = vmax.f32 %v1590_v8, %v3471_v9  ;;  %v638_v8 = vld [vmem:[%s2896_s7 + $0xcd8] sm:$0xff] }
 0x123   : > { %v1123_v15 = vmin.f32 %v1122_v40, %v3475_v59  ;;  %v1703_v44 = vmax.f32 %v1702_v1, %v634_v0  ;;  %v1156_v2 = vmin.f32 %v1155_v14, %v631_v32  ;;  %v1048_v61 = vmin.f32 %v1047_v16, %v525_v12  ;;  %v3503_v32 = vld [vmem:[%s2896_s7 + $0xbb8] sm:$0xff]  ;;  %v3521_v1 = vld [vmem:[%s2896_s7 + $0x970] sm:$0xff] }
 0x124   : > { %v1780_v31 = vmax.f32 %v1779_v60, %v710_v63  ;;  %v1232_v20 = vmin.f32 %v1231_v48, %v706_v13  ;;  %v1662_v40 = vmax.f32 %v1661_v21, %v3436_v24  ;;  %v713_v14 = vld [vmem:[%s2896_s7 + $0xf30] sm:$0xff]  ;;  %v3525_v60 = vld [vmem:[%s2896_s7 + $0xbc8] sm:$0xff] }
 0x125   : > { %v1124_v11 = vmin.f32 %v1123_v15, %v3483_v41  ;;  %v1704_v33 = vmax.f32 %v1703_v44, %v635_v51  ;;  %v1157_v27 = vmin.f32 %v1156_v2, %v632_v18  ;;  %v1049_v17 = vmin.f32 %v1048_v61, %v3489_v5  ;;  %v3531_v2 = vld [vmem:[%s2896_s7 + $0x978] sm:$0xff] }
 0x126   : > { %v1781_v34 = vmax.f32 %v1780_v31, %v711_v46  ;;  %v1233_v13 = vmin.f32 %v1232_v20, %v707_v7  ;;  %v1592_v44 = vmax.f32 %v1591_v57, %v525_v12  ;;  %v714_v61 = vld [vmem:[%s2896_s7 + $0xf38] sm:$0xff] }
 0x127   : > { %v1125_v36 = vmin.f32 %v1124_v11, %v3493_v55  ;;  %v1705_v26 = vmax.f32 %v1704_v33, %v636_v30  ;;  %v1158_v18 = vmin.f32 %v1157_v27, %v633_v19  ;;  %v1050_v45 = vmin.f32 %v1049_v17, %v3499_v22  ;;  %v3542_v17 = vld [vmem:[%s2896_s7 + $0x980] sm:$0xff] }
 0x128   : > { %v1782_v53 = vmax.f32 %v1781_v34, %v712_v47  ;;  %v1234_v7 = vmin.f32 %v1233_v13, %v708_v38  ;;  %v1663_v27 = vmax.f32 %v1662_v40, %v3443_v54  ;;  %v715_v34 = vld [vmem:[%s2896_s7 + $0xf40] sm:$0xff] }
 0x129   : > { %v1126_v9 = vmin.f32 %v1125_v36, %v3503_v32  ;;  %v1706_v16 = vmax.f32 %v1705_v26, %v637_v4  ;;  %v1159_v19 = vmin.f32 %v1158_v18, %v634_v0  ;;  %v1051_v48 = vmin.f32 %v1050_v45, %v3510_v49  ;;  %v3535_v0 = vld [vmem:[%s2896_s7 + $0xbd0] sm:$0xff]  ;;  %v3546_v36 = vld [vmem:[%s2896_s7 + $0xbd8] sm:$0xff]  ;;  %v640_v18 = vld [vmem:[%s2896_s7 + $0xce8] sm:$0xff] }
 0x12a   : > { %v1783_v15 = vmax.f32 %v1782_v53, %v713_v14  ;;  %v1235_v38 = vmin.f32 %v1234_v7, %v709_v39  ;;  %v639_v39 = vld [vmem:[%s2896_s7 + $0xce0] sm:$0xff]  ;;  %v1593_v45 = vmax.f32 %v1592_v44, %v3489_v5  ;;  %v3553_v53 = vld [vmem:[%s2896_s7 + $0x988] sm:$0xff] }
 0x12b   : > { %v1127_v24 = vmin.f32 %v1126_v9, %v3514_v58  ;;  %v1707_v31 = vmax.f32 %v1706_v16, %v638_v8  ;;  %v1160_v20 = vmin.f32 %v1159_v19, %v635_v51  ;;  %v1052_v21 = vmin.f32 %v1051_v48, %v3521_v1  ;;  %v716_v7 = vld [vmem:[%s2896_s7 + $0xf48] sm:$0xff]  ;;  %v3557_v9 = vld [vmem:[%s2896_s7 + $0xbe0] sm:$0xff]  ;;  %v641_v48 = vld [vmem:[%s2896_s7 + $0xcf0] sm:$0xff] }
 0x12c   : > { %v1784_v11 = vmax.f32 %v1783_v15, %v714_v61  ;;  %v1236_v33 = vmin.f32 %v1235_v38, %v710_v63  ;;  %v1664_v15 = vmax.f32 %v1663_v27, %v3451_v50  ;;  %v3564_v38 = vld [vmem:[%s2896_s7 + $0x990] sm:$0xff]  ;;  %v3575_v27 = vld [vmem:[%s2896_s7 + $0x998] sm:$0xff] }
 0x12d   : > { %v1128_v12 = vmin.f32 %v1127_v24, %v3525_v60  ;;  %v1708_v13 = vmax.f32 %v1707_v31, %v639_v39  ;;  %v1161_v51 = vmin.f32 %v1160_v20, %v636_v30  ;;  %v1053_v57 = vmin.f32 %v1052_v21, %v3531_v2  ;;  %v717_v24 = vld [vmem:[%s2896_s7 + $0xf50] sm:$0xff]  ;;  %v3568_v31 = vld [vmem:[%s2896_s7 + $0xbe8] sm:$0xff] }
 0x12e   : > { %v1785_v26 = vmax.f32 %v1784_v11, %v715_v34  ;;  %v1237_v63 = vmin.f32 %v1236_v33, %v711_v46  ;;  %v642_v11 = vld [vmem:[%s2896_s7 + $0xcf8] sm:$0xff]  ;;  %v1594_v33 = vmax.f32 %v1593_v45, %v3499_v22  ;;  %v3586_v45 = vld [vmem:[%s2896_s7 + $0x9a0] sm:$0xff] }
 0x12f   : > { %v1129_v54 = vmin.f32 %v1128_v12, %v3535_v0  ;;  %v1709_v40 = vmax.f32 %v1708_v13, %v640_v18  ;;  %v1162_v30 = vmin.f32 %v1161_v51, %v637_v4  ;;  %v1054_v16 = vmin.f32 %v1053_v57, %v3542_v17  ;;  %v718_v12 = vld [vmem:[%s2896_s7 + $0xf58] sm:$0xff]  ;;  %v3579_v51 = vld [vmem:[%s2896_s7 + $0xbf0] sm:$0xff] }
 0x130   : > { %v1786_v19 = vmax.f32 %v1785_v26, %v716_v7  ;;  %v1238_v46 = vmin.f32 %v1237_v63, %v712_v47  ;;  %v643_v63 = vld [vmem:[%s2896_s7 + $0xd00] sm:$0xff] }
 0x131   : > { %v1130_v5 = vmin.f32 %v1129_v54, %v3546_v36  ;;  %v1710_v44 = vmax.f32 %v1709_v40, %v641_v48  ;;  %v1163_v4 = vmin.f32 %v1162_v30, %v638_v8  ;;  %v1055_v20 = vmin.f32 %v1054_v16, %v3553_v53  ;;  %v719_v40 = vld [vmem:[%s2896_s7 + $0xf60] sm:$0xff]  ;;  %v3590_v16 = vld [vmem:[%s2896_s7 + $0xbf8] sm:$0xff] }
 0x132   : > { %v1787_v21 = vmax.f32 %v1786_v19, %v717_v24  ;;  %v1239_v47 = vmin.f32 %v1238_v46, %v713_v14  ;;  %v1665_v54 = vmax.f32 %v1664_v15, %v3458_v62  ;;  %v1595_v62 = vmax.f32 %v1594_v33, %v3510_v49  ;;  %v3597_v15 = vld [vmem:[%s2896_s7 + $0x9a8] sm:$0xff]  ;;  %v721_v49 = vld [vmem:[%s2896_s7 + $0xf70] sm:$0xff] }
 0x133   : > { %v1131_v50 = vmin.f32 %v1130_v5, %v3557_v9  ;;  %v1711_v13 = vmax.f32 %v1710_v44, %v642_v11  ;;  %v1164_v8 = vmin.f32 %v1163_v4, %v639_v39  ;;  %v1056_v57 = vmin.f32 %v1055_v20, %v3564_v38  ;;  %v644_v5 = vld [vmem:[%s2896_s7 + $0xd08] sm:$0xff] }
 0x134   : > { %v1788_v26 = vmax.f32 %v1787_v21, %v718_v12  ;;  %v1240_v14 = vmin.f32 %v1239_v47, %v714_v61  ;;  %v720_v4 = vld [vmem:[%s2896_s7 + $0xf68] sm:$0xff] }
 0x135   : > { %v1132_v22 = vmin.f32 %v1131_v50, %v3568_v31  ;;  %v1712_v30 = vmax.f32 %v1711_v13, %v643_v63  ;;  %v1165_v39 = vmin.f32 %v1164_v8, %v640_v18  ;;  %v1057_v19 = vmin.f32 %v1056_v57, %v3575_v27  ;;  %v645_v13 = vld [vmem:[%s2896_s7 + $0xd10] sm:$0xff] }
 0x136   : > { %v1789_v46 = vmax.f32 %v1788_v26, %v719_v40  ;;  %v1241_v61 = vmin.f32 %v1240_v14, %v715_v34  ;;  %v1666_v34 = vmax.f32 %v1665_v54, %v3466_v10  ;;  %v3605_v57 = vld [vmem:[%s2896_s7 + $0x9b0] sm:$0xff]  ;;  %v722_v10 = vld [vmem:[%s2896_s7 + $0xf78] sm:$0xff] }
 0x137   : > { %v1133_v44 = vmin.f32 %v1132_v22, %v3579_v51  ;;  %v1713_v20 = vmax.f32 %v1712_v30, %v644_v5  ;;  %v1166_v21 = vmin.f32 %v1165_v39, %v641_v48  ;;  %v1058_v18 = vmin.f32 %v1057_v19, %v3586_v45  ;;  %v646_v30 = vld [vmem:[%s2896_s7 + $0xd18] sm:$0xff] }
 0x138   : > { %v1790_v47 = vmax.f32 %v1789_v46, %v720_v4  ;;  %v1242_v50 = vmin.f32 %v1241_v61, %v716_v7  ;;  %v1596_v7 = vmax.f32 %v1595_v62, %v3521_v1  ;;  %v3612_v39 = vld [vmem:[%s2896_s7 + $0x9b8] sm:$0xff] }
 0x139   : > { %v1134_v8 = vmin.f32 %v1133_v44, %v3590_v16  ;;  %v1714_v33 = vmax.f32 %v1713_v20, %v645_v13  ;;  %v1167_v26 = vmin.f32 %v1166_v21, %v642_v11  ;;  %v1059_v48 = vmin.f32 %v1058_v18, %v3597_v15  ;;  %v647_v44 = vld [vmem:[%s2896_s7 + $0xd20] sm:$0xff] }
 0x13a   : > { %v1791_v14 = vmax.f32 %v1790_v47, %v721_v49  ;;  %v1243_v22 = vmin.f32 %v1242_v50, %v717_v24  ;;  %v1667_v20 = vmax.f32 %v1666_v34, %v3475_v59  ;;  %v3619_v24 = vld [vmem:[%s2896_s7 + $0x9c0] sm:$0xff]  ;;  %v648_v50 = vld [vmem:[%s2896_s7 + $0xd28] sm:$0xff] }
 0x13b   : > { %1135 = vmin.xlane.f32.xlu1 %v1134_v8  ;;  %v1715_v54 = vmax.f32 %v1714_v33, %v646_v30  ;;  %v1168_v19 = vmin.f32 %v1167_v26, %v643_v63  ;;  %v1060_v11 = vmin.f32 %v1059_v48, %v3605_v57  ;;  %v723_v21 = vld [vmem:[%s2896_s7 + $0xf80] sm:$0xff]  ;;  %v1597_v8 = vmax.f32 %v1596_v7, %v3531_v2  ;;  %v3629_v33 = vld [vmem:[%s2896_s7 + $0xf88] sm:$0xff]  ;;  %v725_v2 = vld [vmem:[%s2896_s7 + $0xf90] sm:$0xff] }
 0x13c   : > { %v1792_v46 = vmax.f32 %v1791_v14, %v722_v10  ;;  %v1244_v61 = vmin.f32 %v1243_v22, %v718_v12  ;;  %v3626_v12 = vld [vmem:[%s2896_s7 + $0x9c8] sm:$0xff]  ;;  %v649_v14 = vld [vmem:[%s2896_s7 + $0xd30] sm:$0xff] }
 0x13d   : > { %v1716_v1 = vmax.f32 %v1715_v54, %v647_v44  ;;  %v1169_v62 = vmin.f32 %v1168_v19, %v644_v5  ;;  %v1061_v18 = vmin.f32 %v1060_v11, %v3612_v39  ;;  %v3637_v22 = vld [vmem:[%s2896_s7 + $0x9d0] sm:$0xff] }
 0x13e   : > { %v1793_v63 = vmax.f32 %v1792_v46, %v723_v21  ;;  %v1245_v47 = vmin.f32 %v1244_v61, %v719_v40  ;;  %v1668_v40 = vmax.f32 %v1667_v20, %v3483_v41  ;;  %v650_v46 = vld [vmem:[%s2896_s7 + $0xd38] sm:$0xff]  ;;  %v1598_v61 = vmax.f32 %v1597_v8, %v3542_v17 }
 0x13f   : > { %v1717_v59 = vmax.f32 %v1716_v1, %v648_v50  ;;  %v1170_v34 = vmin.f32 %v1169_v62, %v645_v13  ;;  %v1062_v26 = vmin.f32 %v1061_v18, %v3619_v24  ;;  %v726_v1 = vld [vmem:[%s2896_s7 + $0xf98] sm:$0xff] }
 0x140   : > { %v1794_v5 = vmax.f32 %v1793_v63, %v3629_v33  ;;  %v1246_v48 = vmin.f32 %v1245_v47, %v720_v4  ;;  %v3644_v4 = vld [vmem:[%s2896_s7 + $0x9d8] sm:$0xff]  ;;  %v651_v63 = vld [vmem:[%s2896_s7 + $0xd40] sm:$0xff]  ;;  %v1669_v47 = vmax.f32 %v1668_v40, %v3493_v55  ;;  %v2779_v55 = vmov inf  }
 0x141   : > { %v1718_v7 = vmax.f32 %v1717_v59, %v649_v14  ;;  %v1171_v54 = vmin.f32 %v1170_v34, %v646_v30  ;;  %v1063_v13 = vmin.f32 %v1062_v26, %v3626_v12  ;;  %v3651_v59 = vld [vmem:[%s2896_s7 + $0x9e0] sm:$0xff]  ;;  %213 = vst.msk [vmem:[%s3658_s26 + $0x10] sm:$0xff] %vm210_vm0, %v2779_v55  ;;  %211 = vst.msk [vmem:[%s3658_s26] sm:$0xff] %vm210_vm0, %v2779_v55 }
 0x142   : > { %v1795_v19 = vmax.f32 %v1794_v5, %v725_v2  ;;  %v1247_v11 = vmin.f32 %v1246_v48, %v721_v49  ;;  %v727_v49 = vld [vmem:[%s2896_s7 + $0xfa0] sm:$0xff]  ;;  %212 = vst.msk [vmem:[%s3658_s26 + $0x8] sm:$0xff] %vm210_vm0, %v2779_v55  ;;  %214 = vst.msk [vmem:[%s3658_s26 + $0x18] sm:$0xff] %vm210_vm0, %v2779_v55 }
 0x143   : > { %v1719_v41 = vmax.f32 %v1718_v7, %v650_v46  ;;  %v1172_v20 = vmin.f32 %v1171_v54, %v647_v44  ;;  %v1064_v62 = vmin.f32 %v1063_v13, %v3637_v22  ;;  %v652_v44 = vld [vmem:[%s2896_s7 + $0xd48] sm:$0xff]  ;;  %215 = vst.msk [vmem:[%s3658_s26 + $0x20] sm:$0xff] %vm210_vm0, %v2779_v55  ;;  %216 = vst.msk [vmem:[%s3658_s26 + $0x28] sm:$0xff] %vm210_vm0, %v2779_v55 }
 0x144   : > { %v1796_v18 = vmax.f32 %v1795_v19, %v726_v1  ;;  %v1248_v30 = vmin.f32 %v1247_v11, %v722_v10  ;;  %217 = vst.msk [vmem:[%s3658_s26 + $0x30] sm:$0xff] %vm210_vm0, %v2779_v55  ;;  %218 = vst.msk [vmem:[%s3658_s26 + $0x38] sm:$0xff] %vm210_vm0, %v2779_v55  ;;  %v1599_v10 = vmax.f32 %v1598_v61, %v3553_v53  ;;  %v653_v19 = vld [vmem:[%s2896_s7 + $0xd50] sm:$0xff]  ;;  %v730_v55 = vld [vmem:[%s2896_s7 + $0xfb8] sm:$0xff] }
 0x145   : > { %v1720_v34 = vmax.f32 %v1719_v41, %v651_v63  ;;  %v1173_v17 = vmin.f32 %v1172_v20, %v648_v50  ;;  %v1065_v8 = vmin.f32 %v1064_v62, %v3644_v4  ;;  %v728_v50 = vld [vmem:[%s2896_s7 + $0xfa8] sm:$0xff]  ;;  %v1670_v11 = vmax.f32 %v1669_v47, %v3503_v32  ;;  %v3686_v41 = vld [vmem:[%s2896_s7 + $0x9f0] sm:$0xff] }
 0x146   : > { %v1797_v26 = vmax.f32 %v1796_v18, %v727_v49  ;;  %v1249_v5 = vmin.f32 %v1248_v30, %v723_v21  ;;  %v3678_v21 = vld [vmem:[%s2896_s7 + $0x9e8] sm:$0xff]  ;;  %v729_v20 = vld [vmem:[%s2896_s7 + $0xfb0] sm:$0xff]  ;;  %v654_v30 = vld [vmem:[%s2896_s7 + $0xd58] sm:$0xff] }
 0x147   : > { %v1721_v48 = vmax.f32 %v1720_v34, %v652_v44  ;;  %v1174_v40 = vmin.f32 %v1173_v17, %v649_v14  ;;  %v1066_v7 = vmin.f32 %v1065_v8, %v3651_v59  ;;  %v1600_v34 = vmax.f32 %v1599_v10, %v3564_v38 }
 0x148   : > { %v1798_v54 = vmax.f32 %v1797_v26, %v728_v50  ;;  %v1250_v13 = vmin.f32 %v1249_v5, %v3629_v33  ;;  %v3693_v33 = vld [vmem:[%s2896_s7 + $0x9f8] sm:$0xff]  ;;  %v655_v5 = vld [vmem:[%s2896_s7 + $0xd60] sm:$0xff] }
 0x149   : > { %v1722_v53 = vmax.f32 %v1721_v48, %v653_v19  ;;  %v1175_v61 = vmin.f32 %v1174_v40, %v650_v46  ;;  %v1067_v62 = vmin.f32 %v1066_v7, %v3678_v21  ;;  %v1671_v46 = vmax.f32 %v1670_v11, %v3514_v58  ;;  %v741_v40 = vld [vmem:[%s3658_s26 + $0x10] sm:$0xff] }
 0x14a   : > { %v1799_v18 = vmax.f32 %v1798_v54, %v729_v20  ;;  %v1251_v14 = vmin.f32 %v1250_v13, %v725_v2  ;;  %v1601_v13 = vmax.f32 %v1600_v34, %v3575_v27  ;;  %v657_v11 = vld [vmem:[%s2896_s7 + $0xd70] sm:$0xff] }
 0x14b   : > { %v1723_v17 = vmax.f32 %v1722_v53, %v654_v30  ;;  %v1176_v32 = vmin.f32 %v1175_v61, %v651_v63  ;;  %v1068_v8 = vmin.f32 %v1067_v62, %v3686_v41  ;;  %v656_v63 = vld [vmem:[%s2896_s7 + $0xd68] sm:$0xff] }
 0x14c   : > { %v1252_v26 = vmin.f32 %v1251_v14, %v726_v1  ;;  %v1800_v10 = vmax.f32 %v1799_v18, %v730_v55  ;;  %v1602_v27 = vmax.f32 %v1601_v13, %v3586_v45  ;;  %v662_v13 = vld [vmem:[%s2896_s7 + $0xd98] sm:$0xff] }
 0x14d   : > { %v1724_v2 = vmax.f32 %v1723_v17, %v655_v5  ;;  %v1177_v48 = vmin.f32 %v1176_v32, %v652_v44  ;;  %v1069_v38 = vmin.f32 %v1068_v8, %v3693_v33  ;;  %v731_v44 = vld [vmem:[%s2896_s7 + $0xfc0] sm:$0xff]  ;;  %v658_v17 = vld [vmem:[%s2896_s7 + $0xd78] sm:$0xff] }
 0x14e   : > { %v1253_v7 = vmin.f32 %v1252_v26, %v727_v49  ;;  %v1672_v49 = vmax.f32 %v1671_v46, %v3525_v60  ;;  %v1801_v18 = vmax.f32 %v1800_v10, %v731_v44  ;;  %v659_v32 = vld [vmem:[%s2896_s7 + $0xd80] sm:$0xff]  ;;  %v660_v46 = vld [vmem:[%s2896_s7 + $0xd88] sm:$0xff] }
 0x14f   : > { %v941_v47 = vpop.xlane.xlu1 %940  ;;  %v1725_v1 = vmax.f32 %v1724_v2, %v656_v63  ;;  %v1178_v53 = vmin.f32 %v1177_v48, %v653_v19  ;;  %1070 = vmin.xlane.f32.xlu0 %v1069_v38  ;;  %v733_v48 = vld [vmem:[%s2896_s7 + $0xfd0] sm:$0xff]  ;;  %v734_v38 = vld [vmem:[%s2896_s7 + $0xfd8] sm:$0xff] }
 0x150   : > { %v1269_v54 = vmin.f32 %v741_v40, %v941_v47  ;;  %v1254_v58 = vmin.f32 %v1253_v7, %v728_v50  ;;  %v732_v47 = vld [vmem:[%s2896_s7 + $0xfc8] sm:$0xff] }
 0x151   : > { %v1726_v61 = vmax.f32 %v1725_v1, %v657_v11  ;;  %v1179_v62 = vmin.f32 %v1178_v53, %v654_v30  ;;  %v1673_v30 = vmax.f32 %v1672_v49, %v3535_v0  ;;  %v1802_v2 = vmax.f32 %v1801_v18, %v732_v47  ;;  %v735_v1 = vld [vmem:[%s2896_s7 + $0xfe0] sm:$0xff] }
 0x152   : > { %1278 = vst.msk [vmem:[%s3658_s26 + $0x10] sm:$0xff] %vm210_vm0, %v1269_v54  ;;  %v1255_v14 = vmin.f32 %v1254_v58, %v729_v20  ;;  %v1603_v20 = vmax.f32 %v1602_v27, %v3597_v15  ;;  %v739_v18 = vld [vmem:[%s3658_s26] sm:$0xff]  ;;  %v664_v27 = vld [vmem:[%s2896_s7 + $0xda8] sm:$0xff] }
 0x153   : > { %v1727_v19 = vmax.f32 %v1726_v61, %v658_v17  ;;  %v1180_v34 = vmin.f32 %v1179_v62, %v655_v5  ;;  %v1674_v0 = vmax.f32 %v1673_v30, %v3546_v36  ;;  %v736_v61 = vld [vmem:[%s2896_s7 + $0xfe8] sm:$0xff]  ;;  %v738_v30 = vld [vmem:[%s2896_s7 + $0xff8] sm:$0xff] }
 0x154   : > { %v1256_v50 = vmin.f32 %v1255_v14, %v730_v55  ;;  %v661_v55 = vld [vmem:[%s2896_s7 + $0xd90] sm:$0xff]  ;;  %v1604_v15 = vmax.f32 %v1603_v20, %v3605_v57 }
 0x155   : > { %v1728_v8 = vmax.f32 %v1727_v19, %v659_v32  ;;  %v1181_v26 = vmin.f32 %v1180_v34, %v656_v63  ;;  %v1803_v63 = vmax.f32 %v1802_v2, %v733_v48  ;;  %v1675_v36 = vmax.f32 %v1674_v0, %v3557_v9  ;;  %v737_v19 = vld [vmem:[%s2896_s7 + $0xff0] sm:$0xff] }
 0x156   : > { %v1257_v60 = vmin.f32 %v1256_v50, %v731_v44  ;;  %v663_v44 = vld [vmem:[%s2896_s7 + $0xda0] sm:$0xff]  ;;  %v1605_v57 = vmax.f32 %v1604_v15, %v3612_v39  ;;  %v2555_v15 = vld [vmem:[%s2896_s7 + $0x608] sm:$0xff] }
 0x157   : > { %v1729_v45 = vmax.f32 %v1728_v8, %v660_v46  ;;  %v1182_v40 = vmin.f32 %v1181_v26, %v657_v11  ;;  %v1804_v14 = vmax.f32 %v1803_v63, %v734_v38  ;;  %v665_v8 = vld [vmem:[%s2896_s7 + $0xdb0] sm:$0xff]  ;;  %v1676_v9 = vmax.f32 %v1675_v36, %v3568_v31  ;;  %v2552_v39 = vld [vmem:[%s2896_s7 + $0x200] sm:$0xff] }
 0x158   : > { %v1258_v5 = vmin.f32 %v1257_v60, %v732_v47  ;;  %v667_v63 = vld [vmem:[%s2896_s7 + $0xdc0] sm:$0xff]  ;;  %v669_v36 = vld [vmem:[%s2896_s7 + $0xdd0] sm:$0xff] }
 0x159   : > { %v1730_v10 = vmax.f32 %v1729_v45, %v661_v55  ;;  %v1183_v7 = vmin.f32 %v1182_v40, %v658_v17  ;;  %v2553_v45 = vld [vmem:[%s2896_s7 + $0x208] sm:$0xff]  ;;  %v1677_v31 = vmax.f32 %v1676_v9, %v3579_v51 }
 0x15a   : > { %v1259_v54 = vmin.f32 %v1258_v5, %v733_v48  ;;  %v666_v48 = vld [vmem:[%s2896_s7 + $0xdb8] sm:$0xff]  ;;  %v1357_v40 = vmax.f32 %v2552_v39, %v2553_v45  ;;  %v1606_v5 = vmax.f32 %v1605_v57, %v3619_v24  ;;  %v2558_v57 = vld [vmem:[%s2896_s7 + $0xe00] sm:$0xff] }
 0x15b   : > { %v1731_v53 = vmax.f32 %v1730_v10, %v662_v13  ;;  %v1184_v58 = vmin.f32 %v1183_v7, %v659_v32  ;;  %v1678_v51 = vmax.f32 %v1677_v31, %v3590_v16  ;;  %v1747_v52 = vmax.f32 %v2558_v57, %v2559_v43  ;;  %v2563_v31 = vld [vmem:[%s2896_s7 + $0x408] sm:$0xff] }
 0x15c   : > { %v1260_v11 = vmin.f32 %v1259_v54, %v734_v38  ;;  %v1419_v54 = vmax.f32 %v1418_v25, %v1357_v40  ;;  %v1607_v24 = vmax.f32 %v1606_v5, %v3626_v12  ;;  %v2557_v25 = vld [vmem:[%s2896_s7 + $0xa08] sm:$0xff]  ;;  %v2560_v40 = vld [vmem:[%s2896_s7] sm:$0xff] }
 0x15d   : > { %v1732_v62 = vmax.f32 %v1731_v53, %v663_v44  ;;  %v1185_v49 = vmin.f32 %v1184_v58, %v660_v46  ;;  %v1805_v46 = vmax.f32 %v1804_v14, %v735_v1  ;;  %v2561_v5 = vld [vmem:[%s2896_s7 + $0x8] sm:$0xff] }
 0x15e   : > { %v1261_v17 = vmin.f32 %v1260_v11, %v735_v1  ;;  %v811_v32 = vpop.xlane.xlu0 %810  ;;  %v1608_v12 = vmax.f32 %v1607_v24, %v3637_v22  ;;  %v671_v22 = vld [vmem:[%s2896_s7 + $0xde0] sm:$0xff] }
 0x15f   : > { %v1733_v34 = vmax.f32 %v1732_v62, %v664_v27  ;;  %v1186_v50 = vmin.f32 %v1185_v49, %v661_v55  ;;  %v1267_v26 = vmin.f32 %v739_v18, %v811_v32  ;;  %v1806_v0 = vmax.f32 %v1805_v46, %v736_v61  ;;  %v672_v32 = vld [vmem:[%s2896_s7 + $0xde8] sm:$0xff] }
 0x160   : > { %v1262_v47 = vmin.f32 %v1261_v17, %v736_v61  ;;  %v668_v61 = vld [vmem:[%s2896_s7 + $0xdc8] sm:$0xff]  ;;  %v1617_v62 = vmax.f32 %v2556_v3, %v2557_v25  ;;  %v670_v17 = vld [vmem:[%s2896_s7 + $0xdd8] sm:$0xff] }
 0x161   : > { %v1734_v2 = vmax.f32 %v1733_v34, %v665_v8  ;;  %v1187_v60 = vmin.f32 %v1186_v50, %v662_v13  ;;  %1276 = vst.msk [vmem:[%s3658_s26] sm:$0xff] %vm210_vm0, %v1267_v26  ;;  %v2554_v13 = vld [vmem:[%s2896_s7 + $0x600] sm:$0xff]  ;;  %v746_v25 = vld [vmem:[%s3658_s26 + $0x38] sm:$0xff] }
 0x162   : > { %v1263_v20 = vmin.f32 %v1262_v47, %v737_v19  ;;  %v1487_v1 = vmax.f32 %v2554_v13, %v2555_v15  ;;  %v2564_v13 = vld [vmem:[%s2896_s7 + $0x800] sm:$0xff]  ;;  %v2565_v15 = vld [vmem:[%s2896_s7 + $0x808] sm:$0xff] }
 0x163   : > { %v1735_v55 = vmax.f32 %v1734_v2, %v666_v48  ;;  %v1188_v38 = vmin.f32 %v1187_v60, %v663_v44  ;;  %v1807_v44 = vmax.f32 %v1806_v0, %v737_v19  ;;  %v742_v2 = vld [vmem:[%s3658_s26 + $0x18] sm:$0xff]  ;;  %v673_v60 = vld [vmem:[%s2896_s7 + $0xdf0] sm:$0xff] }
 0x164   : > { %v1264_v10 = vmin.f32 %v1263_v20, %v738_v30  ;;  %v1549_v6 = vmax.f32 %v1548_v56, %v1487_v1  ;;  %v1609_v56 = vmax.f32 %v1608_v12, %v3644_v4  ;;  %v674_v4 = vld [vmem:[%s2896_s7 + $0xdf8] sm:$0xff]  ;;  %v1552_v1 = vmax.f32 %v2564_v13, %v2565_v15 }
 0x165   : > { %v1189_v7 = vmin.f32 %v1188_v38, %v664_v27  ;;  %v1736_v53 = vmax.f32 %v1735_v55, %v667_v63  ;;  %v1808_v14 = vmax.f32 %v1807_v44, %v738_v30  ;;  %v1679_v27 = vmax.f32 %v1678_v51, %v1617_v62 }
 0x166   : > { %1265 = vmin.xlane.f32.xlu1 %v1264_v10 }
 0x167   : > { %v1190_v58 = vmin.f32 %v1189_v7, %v665_v8  ;;  %v1737_v49 = vmax.f32 %v1736_v53, %v668_v61  ;;  %v1809_v47 = vmax.f32 %v1808_v14, %v1747_v52  ;;  %v1610_v8 = vmax.f32 %v1609_v56, %v3651_v59  ;;  %v2562_v7 = vld [vmem:[%s2896_s7 + $0x400] sm:$0xff]  ;;  %v1291_v52 = vld [vmem:[%s3786_s28 + $0x38] sm:$0xff] }
 0x168   : > { %v1292_v59 = vmax.f32 %v2560_v40, %v2561_v5  ;;  %v1422_v0 = vmax.f32 %v2562_v7, %v2563_v31 }
 0x169   : > { %v1191_v11 = vmin.f32 %v1190_v58, %v666_v48  ;;  %v1738_v19 = vmax.f32 %v1737_v49, %v669_v36  ;;  %v1611_v48 = vmax.f32 %v1610_v8, %v3678_v21  ;;  %v1285_v49 = vld [vmem:[%s3786_s28 + $0x8] sm:$0xff] }
 0x16a   : > { %1420 = vmax.xlane.f32.xlu1 %v1419_v54  ;;  %v1354_v21 = vmax.f32 %v1353_v42, %v1292_v59  ;;  %v2567_v42 = vld [vmem:[%s2896_s7 + $0xc08] sm:$0xff] }
 0x16b   : > { %v1192_v18 = vmin.f32 %v1191_v11, %v667_v63  ;;  %v1739_v26 = vmax.f32 %v1738_v19, %v670_v17  ;;  %v1612_v38 = vmax.f32 %v1611_v48, %v3686_v41  ;;  %v1484_v41 = vmax.f32 %v1483_v35, %v1422_v0  ;;  %v740_v35 = vld [vmem:[%s3658_s26 + $0x8] sm:$0xff] }
 0x16c   : > { %v1682_v53 = vmax.f32 %v2566_v37, %v2567_v42  ;;  %v744_v11 = vld [vmem:[%s3658_s26 + $0x28] sm:$0xff] }
 0x16d   : > { %v1193_v16 = vmin.f32 %v1192_v18, %v668_v61  ;;  %v1740_v39 = vmax.f32 %v1739_v26, %v671_v22  ;;  %v1613_v63 = vmax.f32 %v1612_v38, %v3693_v33  ;;  %v743_v61 = vld [vmem:[%s3658_s26 + $0x20] sm:$0xff]  ;;  %v1286_v26 = vld [vmem:[%s3786_s28 + $0x10] sm:$0xff] }
 0x16e   : > { %1550 = vmax.xlane.f32.xlu1 %v1549_v6 }
 0x16f   : > { %v1194_v34 = vmin.f32 %v1193_v16, %v669_v36  ;;  %v1741_v10 = vmax.f32 %v1740_v39, %v672_v32  ;;  %v1614_v28 = vmax.f32 %v1613_v63, %v1552_v1  ;;  %v1287_v16 = vld [vmem:[%s3786_s28 + $0x18] sm:$0xff] }
 0x171   : > { %v1195_v50 = vmin.f32 %v1194_v34, %v670_v17  ;;  %v1742_v54 = vmax.f32 %v1741_v10, %v673_v60  ;;  %v745_v34 = vld [vmem:[%s3658_s26 + $0x30] sm:$0xff] }
 0x172   : > { %1680 = vmax.xlane.f32.xlu1 %v1679_v27  ;;  %v1289_v27 = vld [vmem:[%s3786_s28 + $0x28] sm:$0xff] }
 0x173   : > { %v1196_v30 = vmin.f32 %v1195_v50, %v671_v22  ;;  %v1743_v24 = vmax.f32 %v1742_v54, %v674_v4 }
 0x175   : > { %v1197_v9 = vmin.f32 %v1196_v30, %v672_v32  ;;  %v1006_v46 = vpop.xlane.xlu1 %1005  ;;  %v1744_v29 = vmax.f32 %v1743_v24, %v1682_v53  ;;  %v1284_v32 = vld [vmem:[%s3786_s28] sm:$0xff] }
 0x176   : > { %1810 = vmax.xlane.f32.xlu1 %v1809_v47  ;;  %v1270_v20 = vmin.f32 %v742_v2, %v1006_v46 }
 0x177   : > { %v1198_v45 = vmin.f32 %v1197_v9, %v673_v60  ;;  %v1288_v60 = vld [vmem:[%s3786_s28 + $0x20] sm:$0xff] }
 0x178   : > { %1279 = vst.msk [vmem:[%s3658_s26 + $0x18] sm:$0xff] %vm210_vm0, %v1270_v20 }
 0x179   : > { %v1199_v55 = vmin.f32 %v1198_v45, %v674_v4  ;;  %v1290_v4 = vld [vmem:[%s3786_s28 + $0x30] sm:$0xff] }
 0x17b   : > { %1200 = vmin.xlane.f32.xlu0 %v1199_v55 }
 0x17f   : > { %1355 = vmax.xlane.f32.xlu0 %v1354_v21 }
 0x183   : > { %1485 = vmax.xlane.f32.xlu0 %v1484_v41 }
 0x187   : > { %1615 = vmax.xlane.f32.xlu0 %v1614_v28 }
 0x18a   : > { %v876_v33 = vpop.xlane.xlu0 %875 }
 0x18b   : > { %1745 = vmax.xlane.f32.xlu0 %v1744_v29  ;;  %v1268_v58 = vmin.f32 %v740_v35, %v876_v33 }
 0x18d   : > { %1277 = vst.msk [vmem:[%s3658_s26 + $0x8] sm:$0xff] %vm210_vm0, %v1268_v58 }
 0x1c8   : > { %v1136_v51 = vpop.xlane.xlu1 %1135 }
 0x1c9   : > { %v1272_v44 = vmin.f32 %v744_v11, %v1136_v51 }
 0x1cb   : > { %1281 = vst.msk [vmem:[%s3658_s26 + $0x28] sm:$0xff] %vm210_vm0, %v1272_v44 }
 0x1dc   : > { %v1071_v6 = vpop.xlane.xlu0 %1070 }
 0x1dd   : > { %v1271_v3 = vmin.f32 %v743_v61, %v1071_v6 }
 0x1df   : > { %1280 = vst.msk [vmem:[%s3658_s26 + $0x20] sm:$0xff] %vm210_vm0, %v1271_v3 }
 0x1f3   : > { %v1266_v62 = vpop.xlane.xlu1 %1265 }
 0x1f4   : > { %v1274_v12 = vmin.f32 %v746_v25, %v1266_v62 }
 0x1f6   : > { %1283 = vst.msk [vmem:[%s3658_s26 + $0x38] sm:$0xff] %vm210_vm0, %v1274_v12 }
 0x1f7   : > { %v1421_v18 = vpop.xlane.xlu1 %1420 }
 0x1f8   : > { %v1813_v36 = vmax.f32 %v1285_v49, %v1421_v18 }
 0x1fa   : > { %1821 = vst.msk [vmem:[%s3786_s28 + $0x8] sm:$0xff] %vm210_vm0, %v1813_v36 }
 0x1fb   : > { %v1551_v14 = vpop.xlane.xlu1 %1550 }
 0x1fc   : > { %v1815_v17 = vmax.f32 %v1287_v16, %v1551_v14 }
 0x1fe   : > { %1823 = vst.msk [vmem:[%s3786_s28 + $0x18] sm:$0xff] %vm210_vm0, %v1815_v17 }
 0x1ff   : > { %v1681_v57 = vpop.xlane.xlu1 %1680 }
 0x200   : > { %v1817_v43 = vmax.f32 %v1289_v27, %v1681_v57 }
 0x202   : > { %1825 = vst.msk [vmem:[%s3786_s28 + $0x28] sm:$0xff] %vm210_vm0, %v1817_v43 }
 0x203   : > { %v1811_v56 = vpop.xlane.xlu1 %1810 }
 0x204   : > { %v1819_v19 = vmax.f32 %v1291_v52, %v1811_v56 }
 0x206   : > { %1827 = vst.msk [vmem:[%s3786_s28 + $0x38] sm:$0xff] %vm210_vm0, %v1819_v19 }
 0x208   : > { %v1201_v22 = vpop.xlane.xlu0 %1200 }
 0x209   : > { %v1273_v50 = vmin.f32 %v745_v34, %v1201_v22 }
 0x20b   : > { %1282 = vst.msk [vmem:[%s3658_s26 + $0x30] sm:$0xff] %vm210_vm0, %v1273_v50 }
 0x20c   : > { %v1356_v47 = vpop.xlane.xlu0 %1355 }
 0x20d   : > { %v1812_v8 = vmax.f32 %v1284_v32, %v1356_v47 }
 0x20f   : > { %1820 = vst.msk [vmem:[%s3786_s28] sm:$0xff] %vm210_vm0, %v1812_v8 }
 0x210   : > { %v1486_v30 = vpop.xlane.xlu0 %1485 }
 0x211   : > { %v1814_v2 = vmax.f32 %v1286_v26, %v1486_v30 }
 0x213   : > { %1822 = vst.msk [vmem:[%s3786_s28 + $0x10] sm:$0xff] %vm210_vm0, %v1814_v2 }
 0x214   : > { %v1616_v9 = vpop.xlane.xlu0 %1615 }
 0x215   : > { %v1816_v46 = vmax.f32 %v1288_v60, %v1616_v9  ;;  %1838 = sbr.rel (!%p2842_p9) target bundleno = 589 (0x24d), region = 36 }
 0x217   : > { %1824 = vst.msk [vmem:[%s3786_s28 + $0x20] sm:$0xff] %vm210_vm0, %v1816_v46 }
 0x218   : > { %v1746_v20 = vpop.xlane.xlu0 %1745 }
 0x219   : > { %v1818_v48 = vmax.f32 %v1290_v4, %v1746_v20 }
 0x21b   : > { %1826 = vst.msk [vmem:[%s3786_s28 + $0x30] sm:$0xff] %vm210_vm0, %v1818_v48 }
 0x21c   : > { %s3984_s8 = smov (!%p1841_p8, %s1840_s8), 8 }
 0x21d   : > { %s2333_s18 = sshll.u32 %s3984_s8, 7 }
 0x21e   : > { %p2336_p12 = scmp.eq.s32.totalorder %s2333_s18, 0 }
 0x21f   : > { %s3856_s22 = sshrl.u32 (!%p2336_p12), %s3984_s8, 3 }
 0x220   : > { %1849 = sbr.rel (%p2336_p12) target bundleno = 589 (0x24d), region = 40  ;;  %p2337_p7 = scmp.le.s32.totalorder (!%p2336_p12), %s3856_s22, 0 }
 0x227   : > { %2221 = sbr.rel (%p2337_p7) target bundleno = 568 (0x238), region = 194  ;;  %s3968_s23 = smov (!%p2337_p7), %s3850_s17 }
 0x228   : > { %s3969_s24 = smov (!%p2337_p7), %s3658_s26  ;;  %s3865_s25 = smov (!%p2337_p7), 0  }
 0x229   : > { %s3867_s27 = smov (!%p2337_p7), 0  }
 0x22e LB: >> { %v1925_v39 = vld [vmem:[%s2718_s24] sm:$0xff]  ;;  %v1927_v45 = vld [vmem:[%s2718_s24 + $0x8] sm:$0xff]  ;;  %v1929_v40 = vld [vmem:[%s2718_s24 + $0x10] sm:$0xff]  ;;  %s1941_s29 = sadd.s32 1, %s2722_s25  ;;  %s1919_s27 = sadd.s32 1, %s2726_s27   ;;  %s2726_s27 = sphi %s3867_s27, %s1919_s27   ;;  %s2722_s25 = sphi %s3865_s25, %s3970_s25   ;;  %s2718_s24 = sphi %s3969_s24, %s1946_s24   ;;  %s2714_s23 = sphi %s3968_s23, %s1947_s23  }
 0x22f   : >> { %1926 = vst [vmem:[%s2714_s23] sm:$0xff] %v1925_v39  ;;  %1928 = vst [vmem:[%s2714_s23 + $0x8] sm:$0xff] %v1927_v45  ;;  %v1931_v5 = vld [vmem:[%s2718_s24 + $0x18] sm:$0xff]  ;;  %v1933_v59 = vld [vmem:[%s2718_s24 + $0x20] sm:$0xff]  ;;  %p1942_p10 = scmp.ge.s32.totalorder %s1941_s29, %s3856_s22  ;;  %p1918_p11 = scmp.ge.s32.totalorder %s1919_s27, %s3856_s22 }
 0x230   : >> { %1930 = vst [vmem:[%s2714_s23 + $0x10] sm:$0xff] %v1929_v40  ;;  %v1935_v55 = vld [vmem:[%s2718_s24 + $0x28] sm:$0xff]  ;;  %1932 = vst [vmem:[%s2714_s23 + $0x18] sm:$0xff] %v1931_v5  ;;  %v1937_v38 = vld [vmem:[%s2718_s24 + $0x30] sm:$0xff] }
 0x231   : >> { %1934 = vst [vmem:[%s2714_s23 + $0x20] sm:$0xff] %v1933_v59  ;;  %1936 = vst [vmem:[%s2714_s23 + $0x28] sm:$0xff] %v1935_v55  ;;  %v1939_v10 = vld [vmem:[%s2718_s24 + $0x38] sm:$0xff]  ;;  %s3986_s29 = smov (%p1942_p10, %s1941_s29), 0  ;;  %1921 = sbr.rel (!%p1918_p11) target bundleno = 558 (0x22e), region = 200 }
 0x232   : >> { %1938 = vst [vmem:[%s2714_s23 + $0x30] sm:$0xff] %v1937_v38  ;;  %1940 = vst [vmem:[%s2714_s23 + $0x38] sm:$0xff] %v1939_v10  ;;  %s2338_s30 = sshll.u32 %s3986_s29, 6  ;;  %s3970_s25 = smov %s3986_s29 }
 0x233   : >> { %s1946_s24 = scalar_lea.vmem %s3658_s26, %s2338_s30 [#allocation4]   ;;  %s1947_s23 = scalar_lea.vmem %s3850_s17, %s2338_s30  }
 0x238 PF: > { %s3886_s3 = sand.u32 7, %s3984_s8   ;;  %s2366_s4 = sshll.u32 %s3856_s22, 6 }
 0x239   : > { %s1952_s7 = scalar_lea.vmem %s3658_s26, %s2366_s4 [#allocation4]   ;;  %s1954_s19 = scalar_lea.vmem %s3850_s17, %s2366_s4  }
 0x23a   : > { %p2343_p13 = scmp.le.s32.totalorder %s3886_s3, 0 }
 0x23b   : > { %s2728_s5 = smov (!%p2343_p13), %s1954_s19   ;;  %s2732_s6 = smov (!%p2343_p13), %s1952_s7  }
 0x23c   : > { %2235 = sbr.rel (%p2343_p13) target bundleno = 589 (0x24d), region = 205  ;;  %s2736_s9 = smov (!%p2343_p13), 0  }
 0x23d   : > { %s2740_s15 = smov (!%p2343_p13), 0  }
 0x243 LB: >> { %v1964_v21 = vld [vmem:[%s2734_s6] sm:$0xff]  ;;  %s1966_s8 = sadd.s32 1, %s2738_s9  ;;  %s1958_s15 = sadd.s32 1, %s2742_s15   ;;  %s2742_s15 = sphi %s2740_s15, %s1958_s15   ;;  %s2738_s9 = sphi %s2736_s9, %s2737_s9   ;;  %s2734_s6 = sphi %s2732_s6, %s1971_s6   ;;  %s2730_s5 = sphi %s2728_s5, %s1972_s5  }
 0x244   : >> { %1965 = vst [vmem:[%s2730_s5] sm:$0xff] %v1964_v21  ;;  %p1967_p0 = scmp.ge.s32.totalorder %s1966_s8, %s3886_s3  ;;  %p1957_p2 = scmp.ge.s32.totalorder %s1958_s15, %s3886_s3 }
 0x246   : >> { %s3988_s8 = smov (%p1967_p0, %s1966_s8), 0  ;;  %1960 = sbr.rel (!%p1957_p2) target bundleno = 579 (0x243), region = 211 }
 0x247   : >> { %s2344_s26 = sshll.u32 %s3988_s8, 3  ;;  %s2737_s9 = smov %s3988_s8  }
 0x248   : >> { %s1971_s6 = scalar_lea.vmem %s1952_s7, %s2344_s26 [#allocation4]   ;;  %s1972_s5 = scalar_lea.vmem %s1954_s19, %s2344_s26  }
 0x24d PF: > { %1978 = sbr.rel (!%p2842_p9) target bundleno = 645 (0x285), region = 88  ;;  %s2346_s17 = sshll.u32 (%p2842_p9), %s2702_s12, 3 }
 0x24e   : > { %s2368_s18 = sshll.u32 (%p2842_p9), %s2702_s12, 6  ;;  %s1980_s22 = ssub.s32 (%p2842_p9), 9, %s2346_s17 }
 0x24f   : > { %s3901_s25 = scalar_lea.vmem (%p2842_p9), %s3965_s2, %s2368_s18   ;;  %p1981_p3 = scmp.lt.s32.totalorder (%p2842_p9), %s1980_s22, 8 }
 0x254   : > { %s3990_s22 = smov (!%p1981_p3, %s1980_s22), 8 }
 0x255   : > { %s2347_s27 = sshll.u32 %s3990_s22, 7 }
 0x256   : > { %p2350_p4 = scmp.eq.s32.totalorder %s2347_s27, 0 }
 0x257   : > { %s3907_s21 = sshrl.u32 (!%p2350_p4), %s3990_s22, 3 }
 0x258   : > { %1989 = sbr.rel (%p2350_p4) target bundleno = 645 (0x285), region = 92  ;;  %p2351_p9 = scmp.le.s32.totalorder (!%p2350_p4), %s3907_s21, 0 }
 0x25f   : > { %2249 = sbr.rel (%p2351_p9) target bundleno = 624 (0x270), region = 216  ;;  %s3971_s12 = smov (!%p2351_p9), %s3901_s25 }
 0x260   : > { %s3972_s29 = smov (!%p2351_p9), %s3786_s28  ;;  %s3916_s30 = smov (!%p2351_p9), 0  }
 0x261   : > { %s3918_s3 = smov (!%p2351_p9), 0  }
 0x266 LB: >> { %v2065_v7 = vld [vmem:[%s2750_s29] sm:$0xff]  ;;  %v2067_v31 = vld [vmem:[%s2750_s29 + $0x8] sm:$0xff]  ;;  %v2069_v0 = vld [vmem:[%s2750_s29 + $0x10] sm:$0xff]  ;;  %s2081_s4 = sadd.s32 1, %s2754_s30  ;;  %s2059_s3 = sadd.s32 1, %s2758_s3   ;;  %s2758_s3 = sphi %s3918_s3, %s2059_s3   ;;  %s2754_s30 = sphi %s3916_s30, %s3973_s30   ;;  %s2750_s29 = sphi %s3972_s29, %s2086_s29   ;;  %s2746_s12 = sphi %s3971_s12, %s2087_s12  }
 0x267   : >> { %2066 = vst [vmem:[%s2746_s12] sm:$0xff] %v2065_v7  ;;  %2068 = vst [vmem:[%s2746_s12 + $0x8] sm:$0xff] %v2067_v31  ;;  %v2071_v63 = vld [vmem:[%s2750_s29 + $0x18] sm:$0xff]  ;;  %v2073_v54 = vld [vmem:[%s2750_s29 + $0x20] sm:$0xff]  ;;  %p2082_p1 = scmp.ge.s32.totalorder %s2081_s4, %s3907_s21  ;;  %p2058_p5 = scmp.ge.s32.totalorder %s2059_s3, %s3907_s21 }
 0x268   : >> { %2070 = vst [vmem:[%s2746_s12 + $0x10] sm:$0xff] %v2069_v0  ;;  %v2075_v41 = vld [vmem:[%s2750_s29 + $0x28] sm:$0xff]  ;;  %2072 = vst [vmem:[%s2746_s12 + $0x18] sm:$0xff] %v2071_v63  ;;  %v2077_v13 = vld [vmem:[%s2750_s29 + $0x30] sm:$0xff] }
 0x269   : >> { %2074 = vst [vmem:[%s2746_s12 + $0x20] sm:$0xff] %v2073_v54  ;;  %2076 = vst [vmem:[%s2746_s12 + $0x28] sm:$0xff] %v2075_v41  ;;  %v2079_v15 = vld [vmem:[%s2750_s29 + $0x38] sm:$0xff]  ;;  %s3992_s4 = smov (%p2082_p1, %s2081_s4), 0  ;;  %2061 = sbr.rel (!%p2058_p5) target bundleno = 614 (0x266), region = 222 }
 0x26a   : >> { %2078 = vst [vmem:[%s2746_s12 + $0x30] sm:$0xff] %v2077_v13  ;;  %2080 = vst [vmem:[%s2746_s12 + $0x38] sm:$0xff] %v2079_v15  ;;  %s2352_s7 = sshll.u32 %s3992_s4, 6  ;;  %s3973_s30 = smov %s3992_s4 }
 0x26b   : >> { %s2086_s29 = scalar_lea.vmem %s3786_s28, %s2352_s7 [#allocation5]   ;;  %s2087_s12 = scalar_lea.vmem %s3901_s25, %s2352_s7  }
 0x270 PF: > { %s3937_s19 = sand.u32 7, %s3990_s22   ;;  %s2369_s5 = sshll.u32 %s3907_s21, 6 }
 0x271   : > { %s2092_s6 = scalar_lea.vmem %s3786_s28, %s2369_s5 [#allocation5]   ;;  %s2094_s9 = scalar_lea.vmem %s3901_s25, %s2369_s5  }
 0x272   : > { %p2357_p6 = scmp.le.s32.totalorder %s3937_s19, 0 }
 0x273   : > { %s2760_s15 = smov (!%p2357_p6), %s2094_s9   ;;  %s2764_s8 = smov (!%p2357_p6), %s2092_s6  }
 0x274   : > { %2263 = sbr.rel (%p2357_p6) target bundleno = 645 (0x285), region = 227  ;;  %s2768_s26 = smov (!%p2357_p6), 0  }
 0x275   : > { %s2772_s17 = smov (!%p2357_p6), 0  }
 0x27b LB: >> { %v2104_v1 = vld [vmem:[%s2766_s8] sm:$0xff]  ;;  %s2106_s18 = sadd.s32 1, %s2770_s26  ;;  %s2098_s17 = sadd.s32 1, %s2774_s17   ;;  %s2774_s17 = sphi %s2772_s17, %s2098_s17   ;;  %s2770_s26 = sphi %s2768_s26, %s2769_s26   ;;  %s2766_s8 = sphi %s2764_s8, %s2111_s8   ;;  %s2762_s15 = sphi %s2760_s15, %s2112_s15  }
 0x27c   : >> { %2105 = vst [vmem:[%s2762_s15] sm:$0xff] %v2104_v1  ;;  %p2107_p8 = scmp.ge.s32.totalorder %s2106_s18, %s3937_s19  ;;  %p2097_p12 = scmp.ge.s32.totalorder %s2098_s17, %s3937_s19 }
 0x27e   : >> { %s3994_s18 = smov (%p2107_p8, %s2106_s18), 0  ;;  %2100 = sbr.rel (!%p2097_p12) target bundleno = 635 (0x27b), region = 233 }
 0x27f   : >> { %s2358_s28 = sshll.u32 %s3994_s18, 3  ;;  %s2769_s26 = smov %s3994_s18  }
 0x280   : >> { %s2111_s8 = scalar_lea.vmem %s2092_s6, %s2358_s28 [#allocation5]   ;;  %s2112_s15 = scalar_lea.vmem %s2094_s9, %s2358_s28  }
 0x285 PF: > { %s16_s14 = sadd.s32 1, %s2710_s14   ;;  %s3974_s9 = smov %s2694_s10 }
 0x286   : > { %p13_p7 = scmp.ge.s32.totalorder %s16_s14, 4   ;;  %s3975_s10 = smov %s2698_s11 }
 0x287   : > { %s3976_s11 = smov %s2840_s20  ;;  %s3977_s12 = smov %s2706_s13 }
 0x288   : > { %s3978_s13 = smov %s3980_s16  ;;  %15 = sbr.rel (!%p13_p7) target bundleno = 4 (0x4), region = 244 }
 0x28f   :  { %2135 = vsyncpa [#allocation3], 1 }
 0x290   :  { %2137 = vsyncpa [#allocation3 + $0x1], 1 }

</bundles_post_ra>
